<compile_context>
chip_gen: v7x
topology: tpu7x:2x2x1
jax: 0.10.0
libtpu: 0.0.40
codegen_flags: <defaults>
</compile_context>

<pallas_src>
import functools
import math

import numpy as np
import jax
import jax.numpy as jnp
from jax.experimental import pallas as pl
from jax.experimental.pallas import tpu as pltpu

_LANE = 128  # TPU lane width


def _round_up(a: int, b: int) -> int:
    return ((a + b - 1) // b) * b


def out_channels(in_dim: int, num_freqs: int = 4, include_input: bool = True) -> int:
    """Encoder.out_channels for the frequency encoder."""
    return in_dim * (2 * num_freqs + (1 if include_input else 0))


@functools.lru_cache(maxsize=None)
def _interleave_tables(in_dim: int, num_freqs: int, include_input: bool, g: int):
    """Constant tables describing one lane-dense row of g points.

    m     : (g*in_dim, g*out_dim) selection-and-scale matrix with entries in
            {0, 2^k} (exact in bf16).  (x_row @ m)[q*out_dim + f*in_dim + d]
            == x_row[q*in_dim + d] * scale_f  — i.e. the point-major,
            reference-ordered interleave of all features.
    phase : (1, g*out_dim) f32; 0 on identity / sin lanes, pi/2 on cos lanes.
    keep  : (1, g*out_dim) f32; 1.0 on identity (include_input) lanes.
    """
    include = 1 if include_input else 0
    n_feat = 2 * num_freqs + include
    out_dim = in_dim * n_feat
    w_in, w_out = g * in_dim, g * out_dim
    m = np.zeros((w_in, w_out), np.float32)
    phase = np.zeros((w_out,), np.float32)
    keep = np.zeros((w_out,), np.float32)
    for q in range(g):
        for f in range(n_feat):
            if include_input and f == 0:
                scale, ph, kp = 1.0, 0.0, 1.0
            else:
                k = f - include
                freq_idx, is_cos = divmod(k, 2)
                scale = float(2.0 ** freq_idx)
                ph = (np.pi / 2.0) if is_cos else 0.0
                kp = 0.0
            for d in range(in_dim):
                col = q * out_dim + f * in_dim + d
                m[q * in_dim + d, col] = scale
                phase[col] = ph
                keep[col] = kp
    return m, phase.reshape(1, -1), keep.reshape(1, -1)


def _freq_encode_kernel(x_ref, m_ref, phase_ref, keep_ref, o_ref, *, n_split: int):
    """Encode one lane-dense row tile.

    x_ref     : (TR, W_IN)        flattened input (G points per row)
    m_ref     : (W_IN, W_OUT)     bf16 selection/scale matrix (resident)
    phase_ref : (1, W_OUT)        0 or pi/2 per output lane
    keep_ref  : (1, W_OUT)        1.0 on identity lanes
    o_ref     : (TR, W_OUT)       final interleaved output tile
    """
    x = x_ref[...].astype(jnp.float32)  # f32 math (v5e VPU/EUP have no bf16)
    m = m_ref[...]
    # Gather + 2^k scale on the MXU.  x is fed as (up to) three exact bf16
    # terms so the result is f32-accurate no matter how the backend handles
    # matmul precision; m's entries (0 / powers of two) are exact in bf16.
    acc = jnp.dot(x.astype(jnp.bfloat16), m, preferred_element_type=jnp.float32)
    r = x
    for _ in range(n_split - 1):
        r = r - r.astype(jnp.bfloat16).astype(jnp.float32)
        acc = acc + jnp.dot(r.astype(jnp.bfloat16), m,
                            preferred_element_type=jnp.float32)
    # One transcendental per output lane, full 128-lane utilization:
    # cos lanes carry a +pi/2 phase so a single sin covers both.
    enc = jnp.sin(acc + phase_ref[...])
    out = jnp.where(keep_ref[...] > 0.5, acc, enc)
    o_ref[...] = out.astype(o_ref.dtype)


def frequency_encode(x: jax.Array,
                     num_freqs: int = 4,
                     include_input: bool = True,
                     row_tile: int = 512,
                     out_dtype=None) -> jax.Array:
    """Encoder.forward: [..., in_dim] -> [..., in_dim * (2*num_freqs + include_input)]."""
    orig_shape = x.shape
    in_dim = int(orig_shape[-1])
    include = 1 if include_input else 0
    n_feat = 2 * num_freqs + include
    if n_feat == 0:
        raise ValueError("num_freqs=0 with include_input=False yields no features.")
    out_dim = in_dim * n_feat
    out_dtype = jnp.dtype(x.dtype if out_dtype is None else out_dtype)
    in_item = jnp.dtype(x.dtype).itemsize
    out_item = out_dtype.itemsize

    # G points per lane-dense row; W_IN / W_OUT are multiples of 128.
    g = _LANE // math.gcd(in_dim, _LANE)
    w_in, w_out = g * in_dim, g * out_dim
    if w_in > 1024:
        # TODO(synk): in_dim with a large odd factor blows up the interleave
        # table; fall back to a feature-major kernel for that case.
        raise NotImplementedError("frequency_encode: unsupported (large odd) in_dim")

    n_elems = math.prod(orig_shape)
    n_pts = n_elems // in_dim
    n_rows = pl.cdiv(n_elems, w_in)

    # Sublane granularity for the row tile (covers both input and output dtypes).
    sub = max(32 // max(in_item, 1), 32 // max(out_item, 1))

    # Row-tile / VMEM budget (leave headroom below v7x's 64 MiB physical VMEM).
    try:
        vmem_cap = int(pltpu.get_tpu_info().vmem_capacity_bytes)
    except Exception:
        vmem_cap = 64 << 20
    budget = min(int(vmem_cap * 0.6), 48 << 20)
    aux_bytes = w_in * w_out * 2 + 2 * w_out * 4          # m (bf16) + phase + keep
    per_row = 2 * (w_in * in_item + w_out * out_item) + 4 * w_out * 4
    avail = max(budget - 2 * aux_bytes, per_row * sub)
    tr_budget = max(sub, ((avail // per_row) // sub) * sub)
    tr_max = max(sub, min((row_tile // sub) * sub, tr_budget))

    if n_rows <= tr_max:
        rows_pad = _round_up(n_rows, sub)
        tr = rows_pad
    else:
        tr = 0
        for cand in range(tr_max, sub - 1, -sub):          # prefer a divisor: no tail pad
            if n_rows % cand == 0:
                tr = cand
                break
        if tr < max(sub, tr_max // 4):                     # avoid tiny tiles
            tr = tr_max
        rows_pad = _round_up(n_rows, tr)

    flat = x.reshape(-1)
    elems_pad = rows_pad * w_in
    if elems_pad != n_elems:
        # Zero pad; the tail is computed (sin/cos of 0) and sliced off below.
        flat = jnp.pad(flat, (0, elems_pad - n_elems))
    x2 = flat.reshape(rows_pad, w_in)                      # free, order-preserving reshape

    m_np, phase_np, keep_np = _interleave_tables(in_dim, num_freqs, include_input, g)
    m = jnp.asarray(m_np, jnp.bfloat16)                    # 0 / 2^k: exact in bf16
    phase = jnp.asarray(phase_np, jnp.float32)
    keep = jnp.asarray(keep_np, jnp.float32)

    if in_item >= 4:
        n_split = 3            # f32 input -> 3 exact bf16 terms
    elif jnp.dtype(x.dtype) == jnp.float16:
        n_split = 2
    else:
        n_split = 1            # bf16 input is already exact in one term

    grid = (rows_pad // tr,)
    kernel = functools.partial(_freq_encode_kernel, n_split=n_split)

    out = pl.pallas_call(
        kernel,
        out_shape=jax.ShapeDtypeStruct((rows_pad, w_out), out_dtype),
        grid=grid,
        in_specs=[
            pl.BlockSpec((tr, w_in), lambda i: (i, 0)),
            pl.BlockSpec((w_in, w_out), lambda i: (0, 0)),   # resident (constant index)
            pl.BlockSpec((1, w_out), lambda i: (0, 0)),
            pl.BlockSpec((1, w_out), lambda i: (0, 0)),
        ],
        out_specs=pl.BlockSpec((tr, w_out), lambda i: (i, 0)),
        compiler_params=pltpu.CompilerParams(
            dimension_semantics=("parallel",),   # independent row tiles (v7x megacore)
            vmem_limit_bytes=int(budget),
        ),
        cost_estimate=pl.CostEstimate(
            flops=2 * n_split * rows_pad * w_in * w_out,
            transcendentals=rows_pad * w_out,
            bytes_accessed=elems_pad * in_item + rows_pad * w_out * out_item + aux_bytes,
        ),
    )(x2, m, phase, keep)

    # Free reshape back to points-major; slice only when padding was needed.
    out = out.reshape(rows_pad * g, out_dim)
    if rows_pad * g != n_pts:
        out = out[:n_pts]
    return out.reshape(*orig_shape[:-1], out_dim)


def _reference(x, num_freqs=4, include_input=True):
    feats = [x] if include_input else []
    for k in range(num_freqs):
        xs = x * (2.0 ** k)
        feats.append(jnp.sin(xs))
        feats.append(jnp.cos(xs))
    return jnp.concatenate(feats, axis=-1)


if __name__ == "__main__":
    key = jax.random.PRNGKey(0)
    k1, k2, k3 = jax.random.split(key, 3)

    # 1) Small NeRF-style batch, in_dim=4, L=4 (pads a partial row tile).
    x1 = jax.random.normal(k1, (2, 8, 4), dtype=jnp.float32)
    y1 = jax.block_until_ready(frequency_encode(x1, num_freqs=4, include_input=True))
    r1 = _reference(x1, 4, True)
    assert y1.shape == (2, 8, 36), y1.shape
    assert jnp.allclose(y1, r1, atol=1e-5, rtol=1e-5), "mismatch vs reference (case 1)"

    # 2) in_dim=3 with a ragged point count (exercises padding + tail slice).
    x2 = jax.random.normal(k2, (4, 123, 3), dtype=jnp.float32)
    y2 = jax.block_until_ready(frequency_encode(x2, num_freqs=4, include_input=True))
    r2 = _reference(x2, 4, True)
    assert y2.shape == (4, 123, 27), y2.shape
    assert jnp.allclose(y2, r2, atol=1e-5, rtol=1e-5), "mismatch vs reference (case 2)"

    # 3) Multi-block grid on the clean (pad-free) fast path, include_input=False.
    x3 = jax.random.normal(k3, (4096, 4), dtype=jnp.float32)
    y3 = jax.block_until_ready(
        frequency_encode(x3, num_freqs=3, include_input=False, row_tile=64))
    r3 = _reference(x3, 3, False)
    assert y3.shape == (4096, 24), y3.shape
    assert jnp.allclose(y3, r3, atol=1e-5, rtol=1e-5), "mismatch vs reference (case 3)"

    # 4) bf16 output option (halves the dominant HBM write traffic), f32 math in-kernel.
    y4 = jax.block_until_ready(
        frequency_encode(x3, num_freqs=3, include_input=False, out_dtype=jnp.bfloat16))
    assert y4.dtype == jnp.bfloat16
    assert jnp.allclose(y4.astype(jnp.float32), r3, atol=2e-2, rtol=2e-2), \
        "mismatch vs reference (case 4, bf16 out)"

    print("KERNEL_OK")
</pallas_src>

<mosaic_0001>
module attributes {stable_mosaic.version = 11 : i64} {
  func.func @_freq_encode_kernel(%arg0: i32, %arg1: memref<8x128xf32, #tpu.memory_space<vmem>>, %arg2: memref<128x1152xbf16, #tpu.memory_space<vmem>>, %arg3: memref<1x1152xf32, #tpu.memory_space<vmem>>, %arg4: memref<1x1152xf32, #tpu.memory_space<vmem>>, %arg5: memref<8x1152xf32, #tpu.memory_space<vmem>>) attributes {dimension_semantics = [#tpu.dimension_semantics<parallel>], iteration_bounds = array<i64: 1>, scalar_prefetch = 0 : i64, scratch_operands = 0 : i64, tpu.core_type = #tpu.core_type<tc>, window_params = [{transform_indices = @transform_0, window_bounds = array<i64: 8, 128>}, {pipeline_mode = #tpu.pipeline_mode<synchronous>, transform_indices = @transform_1, window_bounds = array<i64: 128, 1152>}, {pipeline_mode = #tpu.pipeline_mode<synchronous>, transform_indices = @transform_2, window_bounds = array<i64: 1, 1152>}, {pipeline_mode = #tpu.pipeline_mode<synchronous>, transform_indices = @transform_3, window_bounds = array<i64: 1, 1152>}, {transform_indices = @transform_4, window_bounds = array<i64: 8, 1152>}]} {
    %c0 = arith.constant 0 : index
    %c0_0 = arith.constant 0 : index
    %0 = vector.load %arg1[%c0, %c0_0] : memref<8x128xf32, #tpu.memory_space<vmem>>, vector<8x128xf32>
    %c0_1 = arith.constant 0 : index
    %c0_2 = arith.constant 0 : index
    %1 = vector.load %arg2[%c0_1, %c0_2] : memref<128x1152xbf16, #tpu.memory_space<vmem>>, vector<128x1152xbf16>
    %2 = arith.truncf %0 : vector<8x128xf32> to vector<8x128xbf16>
    %cst = arith.constant dense<0.000000e+00> : vector<8x1152xf32>
    %3 = tpu.matmul %2, %1, %cst {dimension_numbers = #tpu.dot_dimension_numbers<[1], [0], [0], [1], [0, 0, 1, 1], [], []>} : vector<8x128xbf16>, vector<128x1152xbf16>, vector<8x1152xf32> -> vector<8x1152xf32>
    %4 = arith.truncf %0 : vector<8x128xf32> to vector<8x128xbf16>
    %5 = arith.extf %4 : vector<8x128xbf16> to vector<8x128xf32>
    %6 = arith.subf %0, %5 : vector<8x128xf32>
    %7 = arith.truncf %6 : vector<8x128xf32> to vector<8x128xbf16>
    %cst_3 = arith.constant dense<0.000000e+00> : vector<8x1152xf32>
    %8 = tpu.matmul %7, %1, %cst_3 {dimension_numbers = #tpu.dot_dimension_numbers<[1], [0], [0], [1], [0, 0, 1, 1], [], []>} : vector<8x128xbf16>, vector<128x1152xbf16>, vector<8x1152xf32> -> vector<8x1152xf32>
    %9 = arith.addf %3, %8 : vector<8x1152xf32>
    %10 = arith.truncf %6 : vector<8x128xf32> to vector<8x128xbf16>
    %11 = arith.extf %10 : vector<8x128xbf16> to vector<8x128xf32>
    %12 = arith.subf %6, %11 : vector<8x128xf32>
    %13 = arith.truncf %12 : vector<8x128xf32> to vector<8x128xbf16>
    %cst_4 = arith.constant dense<0.000000e+00> : vector<8x1152xf32>
    %14 = tpu.matmul %13, %1, %cst_4 {dimension_numbers = #tpu.dot_dimension_numbers<[1], [0], [0], [1], [0, 0, 1, 1], [], []>} : vector<8x128xbf16>, vector<128x1152xbf16>, vector<8x1152xf32> -> vector<8x1152xf32>
    %15 = arith.addf %9, %14 : vector<8x1152xf32>
    %c0_5 = arith.constant 0 : index
    %c0_6 = arith.constant 0 : index
    %16 = vector.load %arg3[%c0_5, %c0_6] : memref<1x1152xf32, #tpu.memory_space<vmem>>, vector<1x1152xf32>
    %17 = vector.broadcast %16 : vector<1x1152xf32> to vector<8x1152xf32>
    %18 = arith.addf %15, %17 : vector<8x1152xf32>
    %19 = math.sin %18 : vector<8x1152xf32>
    %c0_7 = arith.constant 0 : index
    %c0_8 = arith.constant 0 : index
    %20 = vector.load %arg4[%c0_7, %c0_8] : memref<1x1152xf32, #tpu.memory_space<vmem>>, vector<1x1152xf32>
    %cst_9 = arith.constant 5.000000e-01 : f32
    %21 = vector.broadcast %cst_9 : f32 to vector<1x1152xf32>
    %22 = arith.cmpf ogt, %20, %21 : vector<1x1152xf32>
    %23 = vector.shape_cast %22 : vector<1x1152xi1> to vector<1x1152xi1>
    %24 = vector.broadcast %23 : vector<1x1152xi1> to vector<8x1152xi1>
    %25 = arith.select %24, %15, %19 : vector<8x1152xi1>, vector<8x1152xf32>
    %c0_10 = arith.constant 0 : index
    %c0_11 = arith.constant 0 : index
    %26 = vector.load %arg5[%c0_10, %c0_11] : memref<8x1152xf32, #tpu.memory_space<vmem>>, vector<8x1152xf32>
    tpu.vector_store %arg5[%c0_10, %c0_11], %25 {strides = array<i32>} : memref<8x1152xf32, #tpu.memory_space<vmem>>, vector<8x1152xf32>,
    return
  }
  func.func @transform_0(%arg0: i32) -> (i32, i32) {
    %c0_i32 = arith.constant 0 : i32
    %c0_i32_0 = arith.constant 0 : i32
    return %arg0, %c0_i32 : i32, i32
  }
  func.func @transform_1(%arg0: i32) -> (i32, i32) {
    %c0_i32 = arith.constant 0 : i32
    %c0_i32_0 = arith.constant 0 : i32
    %c0_i32_1 = arith.constant 0 : i32
    return %c0_i32, %c0_i32_0 : i32, i32
  }
  func.func @transform_2(%arg0: i32) -> (i32, i32) {
    %c0_i32 = arith.constant 0 : i32
    %c0_i32_0 = arith.constant 0 : i32
    %c0_i32_1 = arith.constant 0 : i32
    return %c0_i32, %c0_i32_0 : i32, i32
  }
  func.func @transform_3(%arg0: i32) -> (i32, i32) {
    %c0_i32 = arith.constant 0 : i32
    %c0_i32_0 = arith.constant 0 : i32
    %c0_i32_1 = arith.constant 0 : i32
    return %c0_i32, %c0_i32_0 : i32, i32
  }
  func.func @transform_4(%arg0: i32) -> (i32, i32) {
    %c0_i32 = arith.constant 0 : i32
    %c0_i32_0 = arith.constant 0 : i32
    return %arg0, %c0_i32 : i32, i32
  }
}

</mosaic_0001>

<bundles_post_ra>
// kernel: tpu_custom_call.1
= control target key start
LH: loop header
LB: loop body
LE: loop exit
PB: predicated region body
PF: predicated region fallthrough
CT: control target
= control target key end

     0   :  { %9 = vsyncpa [#allocation3], 0  ;;  %s4070_s0 = inlined_call_operand.hbm [shape: f32[8,128], index: 0, kind: input, shape index: {}]   ;;  %s4071_s1 = inlined_call_operand.hbm [shape: bf16[128,1152], index: 1, kind: input, shape index: {}]   ;;  %s4072_s2 = inlined_call_operand.hbm [shape: f32[1,1152], index: 2, kind: input, shape index: {}]   ;;  %s4073_s3 = inlined_call_operand.vmem [shape: f32[1,1152], index: 3, kind: input, shape index: {}]   ;;  %s4074_s4 = inlined_call_operand.hbm [shape: f32[8,1152], index: 4, kind: output, shape index: {}]  }
   0x1   :  { %10 = vsyncpa [#allocation6], 0 }
   0x2   :  { %11 = vsyncpa [#allocation4], 0  ;;  %s2732_s15 = smov [#allocation5]   ;;  %s2638_s19 = scalar_lea.hbm %s4071_s1, 9216 }
   0x3   :  { %s27_s16 = sshll.u32 %s2732_s15, 4  ;;  %p2639_p0 = scmp.ne.s32.totalorder %s4071_s1, %s2638_s19  ;;  %s28_s16 = int_to_ptr.vmem [resolvable:$true] %s27_s16 }
   0x4   :  { %p2642_p1 = scmp.lt.u32.totalorder %s2638_s19, %s4071_s1 }
   0x6   :  { %p2644_p2 = pnand %p2642_p1, %p2639_p0 }
   0x8   :  { %2647 = shalt.err (!%p2644_p2)
}
   0x9   :  { %s2648_s24 = scalar_lea.vmem %s28_s16, 9216  ;;  %p2653_p4 = scmp.lt.s32.totalorder %s28_s16, %s28_s16 }
   0xa   :  { %p2649_p3 = scmp.ne.s32.totalorder %s28_s16, %s2648_s24  ;;  %p2654_p5 = scmp.lt.s32.totalorder %s2648_s24, %s2648_s24 }
   0xc   :  { %p2655_p6 = por %p2654_p5, %p2653_p4 }
   0xe   :  { %p2656_p7 = pnand %p2655_p6, %p2649_p3 }
  0x10   :  { %2659 = shalt.err (!%p2656_p7)
}
  0x11   :  { %s2733_s25 = smov 576   ;;  %s2734_s26 = smov 36  }
  0x12   :  { %33 = dma.hbm_to_vmem [thread:$0]  %s4071_s1, 9216, %s28_s16, [#allocation6], %s2733_s25, %s2733_s25, %s2734_s26  }
  0x13   :  { %s2735_s29 = smov [#allocation2]   ;;  %s2736_s5 = smov [#allocation7]  }
  0x14   :  { %s18_s30 = sshll.u32 %s2735_s29, 4  ;;  %s40_s6 = sshll.u32 %s2736_s5, 4  ;;  %s19_s30 = int_to_ptr.vmem [resolvable:$true] %s18_s30  ;;  %s41_s6 = int_to_ptr.vmem [resolvable:$true] %s40_s6 }
  0x15   :  { %s2660_s9 = scalar_lea.hbm %s4070_s0, 128 }
  0x16   :  { %p2661_p8 = scmp.ne.s32.totalorder %s4070_s0, %s2660_s9  ;;  %p2664_p9 = scmp.lt.u32.totalorder %s2660_s9, %s4070_s0 }
  0x18   :  { %p2666_p10 = pnand %p2664_p9, %p2661_p8 }
  0x1a   :  { %2669 = shalt.err (!%p2666_p10)
}
  0x1b   :  { %s2670_s1 = scalar_lea.vmem %s19_s30, 128  ;;  %p2675_p12 = scmp.lt.s32.totalorder %s19_s30, %s19_s30 }
  0x1c   :  { %p2671_p11 = scmp.ne.s32.totalorder %s19_s30, %s2670_s1  ;;  %p2676_p13 = scmp.lt.s32.totalorder %s2670_s1, %s2670_s1 }
  0x1e   :  { %p2677_p0 = por %p2676_p13, %p2675_p12 }
  0x20   :  { %p2678_p1 = pnand %p2677_p0, %p2671_p11 }
  0x22   :  { %2681 = shalt.err (!%p2678_p1)
}
  0x23   :  { %21 = dma.hbm_to_vmem [thread:$0]  %s4070_s0, 128, %s19_s30, [#allocation3]  }
  0x24   :  { %s2682_s18 = scalar_lea.hbm %s4072_s2, 144 }
  0x25   :  { %p2683_p2 = scmp.ne.s32.totalorder %s4072_s2, %s2682_s18  ;;  %p2686_p3 = scmp.lt.u32.totalorder %s2682_s18, %s4072_s2 }
  0x27   :  { %p2688_p4 = pnand %p2686_p3, %p2683_p2 }
  0x29   :  { %2691 = shalt.err (!%p2688_p4)
}
  0x2a   :  { %s2692_s23 = scalar_lea.vmem %s41_s6, 144  ;;  %s2696_s24 = scalar_lea.vmem %s41_s6, 160 }
  0x2b   :  { %p2693_p5 = scmp.ne.s32.totalorder %s41_s6, %s2692_s23  ;;  %p2697_p6 = scmp.lt.s32.totalorder %s41_s6, %s41_s6 }
  0x2c   :  { %p2698_p7 = scmp.lt.s32.totalorder %s2696_s24, %s2692_s23 }
  0x2e   :  { %p2699_p8 = por %p2698_p7, %p2697_p6 }
  0x30   :  { %p2700_p9 = pnand %p2699_p8, %p2693_p5 }
  0x32   :  { %2703 = shalt.err (!%p2700_p9)
}
  0x33   :  { %43 = dma.hbm_to_vmem [thread:$0]  %s4072_s2, 144, %s41_s6, [#allocation6]  }
  0x34   :  { %2726 = dma.done.wait [#allocation3], 128  }
  0x35   :  { %2727 = vsyncadd [#allocation3], 4294967168 }
  0x36   :  { %2728 = dma.done.wait [#allocation6], 9360  }
  0x37   :  { %2729 = vsyncadd [#allocation6], 4294957936  ;;  %v4075_v0 = vmov 0   ;;  %v2810_v1 = vld [vmem:[#allocation5 + $0x4] ss:$36 sps:$4 sm:$0xff]   ;;  %v56_v28 = vld [vmem:[#allocation2] sm:$0xff] }
  0x38   :  { %541 = vmatprep.mubr.bf16.mxu1 %v4075_v0  ;;  %623 = vmatprep.mubr.bf16.mxu0 %v4075_v0  ;;  %4104 = vst [vmem:[#allocation12_spill] sm:$0xff] %v2810_v1  ;;  %v2812_v2 = vld [vmem:[#allocation5 + $0x14] ss:$36 sps:$4 sm:$0xff]   ;;  %v2815_v3 = vld [vmem:[#allocation5] ss:$36 sps:$4 sm:$0xff]   ;;  %v2888_v30 = vpack.c.bf16 %v56_v28, %v56_v28  ;;  %v4079_v41 = vmov 0.0  }
  0x39   :  { %509 = vmatprep.subr.bf16.mxu1 %v2810_v1  ;;  %4105 = vst [vmem:[#allocation13_spill] sm:$0xff] %v2815_v3  ;;  %v2817_v4 = vld [vmem:[#allocation5 + $0x10] ss:$36 sps:$4 sm:$0xff]   ;;  %591 = vmatprep.subr.bf16.mxu0 %v2812_v2  ;;  %v2824_v6 = vld [vmem:[#allocation5 + $0x5c] ss:$36 sps:$4 sm:$0xff]   ;;  %vm2739_vm0 = vmmov 0  }
  0x3a   :  { %v2820_v5 = vld [vmem:[#allocation5 + $0x4c] ss:$36 sps:$4 sm:$0xff]   ;;  %510 = vmatpush1.bf16.msra.mxu1 %v2815_v3  ;;  %592 = vmatpush1.bf16.msra.mxu0 %v2817_v4  ;;  %v2829_v8 = vld [vmem:[#allocation5 + $0x58] ss:$36 sps:$4 sm:$0xff]   ;;  %v2834_v10 = vld [vmem:[#allocation5 + $0xa4] ss:$36 sps:$4 sm:$0xff]   ;;  %v138_v33 = vunpack.c.l.bf16 %v2888_v30 }
  0x3b   :  { %4106 = vst [vmem:[#allocation14_spill] sm:$0xff] %v2820_v5  ;;  %v2826_v7 = vld [vmem:[#allocation5 + $0x48] ss:$36 sps:$4 sm:$0xff]   ;;  %511 = vmatprep.subr.bf16.mxu1 %v2820_v5  ;;  %593 = vmatprep.subr.bf16.mxu0 %v2824_v6  ;;  %v2832_v9 = vld [vmem:[#allocation5 + $0x94] ss:$36 sps:$4 sm:$0xff]   ;;  %s2746_s29 = smov [#allocation8]  }
  0x3c   :  { %4107 = vst [vmem:[#allocation15_spill] sm:$0xff] %v2826_v7  ;;  %4108 = vst [vmem:[#allocation16_spill] sm:$0xff] %v2832_v9  ;;  %v2836_v11 = vld [vmem:[#allocation5 + $0x90] ss:$36 sps:$4 sm:$0xff]   ;;  %v2838_v12 = vld [vmem:[#allocation5 + $0xa0] ss:$36 sps:$4 sm:$0xff]   ;;  %v2901_v35 = vsub.f32 %v56_v28, %v138_v33 }
  0x3d   :  { %4109 = vst [vmem:[#allocation17_spill] sm:$0xff] %v2836_v11  ;;  %v2842_v13 = vld [vmem:[#allocation5 + $0xdc] ss:$36 sps:$4 sm:$0xff]   ;;  %v2846_v14 = vld [vmem:[#allocation5 + $0xec] ss:$36 sps:$4 sm:$0xff]   ;;  %s2202_s30 = sshll.u32 %s2746_s29, 4  ;;  %s2203_s30 = int_to_ptr.vmem [resolvable:$true] %s2202_s30 }
  0x3e   :  { %512 = vmatpush1.bf16.msra.mxu1 %v2826_v7  ;;  %594 = vmatpush1.bf16.msra.mxu0 %v2829_v8  ;;  %4110 = vst [vmem:[#allocation18_spill] sm:$0xff] %v2842_v13  ;;  %v2848_v15 = vld [vmem:[#allocation5 + $0xd8] ss:$36 sps:$4 sm:$0xff]   ;;  %v2852_v16 = vld [vmem:[#allocation5 + $0xe8] ss:$36 sps:$4 sm:$0xff]   ;;  %v2915_v39 = vpack.c.bf16 %v2901_v35, %v2901_v35  ;;  %p2709_p11 = scmp.lt.s32.totalorder %s2203_s30, %s2203_s30 }
  0x3f   :  { %513 = vmatprep.subr.bf16.mxu1 %v2832_v9  ;;  %595 = vmatprep.subr.bf16.mxu0 %v2834_v10  ;;  %4111 = vst [vmem:[#allocation19_spill] sm:$0xff] %v2848_v15  ;;  %v2854_v17 = vld [vmem:[#allocation5 + $0x124] ss:$36 sps:$4 sm:$0xff]   ;;  %v2858_v18 = vld [vmem:[#allocation5 + $0x134] ss:$36 sps:$4 sm:$0xff]  }
  0x40   :  { %4112 = vst [vmem:[#allocation20_spill] sm:$0xff] %v2854_v17  ;;  %v2860_v19 = vld [vmem:[#allocation5 + $0x120] ss:$36 sps:$4 sm:$0xff]   ;;  %v2862_v20 = vld [vmem:[#allocation5 + $0x130] ss:$36 sps:$4 sm:$0xff]   ;;  %v917_v28 = vunpack.c.l.bf16 %v2915_v39 }
  0x41   :  { %4113 = vst [vmem:[#allocation21_spill] sm:$0xff] %v2860_v19  ;;  %v2866_v21 = vld [vmem:[#allocation5 + $0x16c] ss:$36 sps:$4 sm:$0xff]   ;;  %v2870_v22 = vld [vmem:[#allocation5 + $0x17c] ss:$36 sps:$4 sm:$0xff]  }
  0x42   :  { %514 = vmatpush1.bf16.msra.mxu1 %v2836_v11  ;;  %596 = vmatpush1.bf16.msra.mxu0 %v2838_v12  ;;  %v2872_v23 = vld [vmem:[#allocation5 + $0x168] ss:$36 sps:$4 sm:$0xff]   ;;  %v2876_v24 = vld [vmem:[#allocation5 + $0x178] ss:$36 sps:$4 sm:$0xff]   ;;  %v2884_v27 = vld [vmem:[#allocation5 + $0x1b0] ss:$36 sps:$4 sm:$0xff]   ;;  %v3002_v33 = vsub.f32 %v2901_v35, %v917_v28 }
  0x43   :  { %515 = vmatprep.subr.bf16.mxu1 %v2842_v13  ;;  %597 = vmatprep.subr.bf16.mxu0 %v2846_v14  ;;  %v2878_v25 = vld [vmem:[#allocation5 + $0x1b4] ss:$36 sps:$4 sm:$0xff]   ;;  %v2882_v26 = vld [vmem:[#allocation5 + $0x1c4] ss:$36 sps:$4 sm:$0xff]   ;;  %v2892_v31 = vld [vmem:[#allocation5 + $0x1fc] ss:$36 sps:$4 sm:$0xff]  }
  0x44   :  { %v2886_v29 = vld [vmem:[#allocation5 + $0x1c0] ss:$36 sps:$4 sm:$0xff]   ;;  %v2896_v32 = vld [vmem:[#allocation5 + $0x20c] ss:$36 sps:$4 sm:$0xff]   ;;  %v2899_v34 = vld [vmem:[#allocation5 + $0x1f8] ss:$36 sps:$4 sm:$0xff]  }
  0x45   :  { %v2905_v36 = vld [vmem:[#allocation5 + $0x208] ss:$36 sps:$4 sm:$0xff]   ;;  %v2919_v40 = vld [vmem:[#allocation5 + $0x20] ss:$36 sps:$4 sm:$0xff]   ;;  %v2923_v42 = vld [vmem:[#allocation5 + $0x54] ss:$36 sps:$4 sm:$0xff]  }
  0x46   :  { %516 = vmatpush1.bf16.msra.mxu1 %v2848_v15  ;;  %598 = vmatpush1.bf16.msra.mxu0 %v2852_v16  ;;  %v2909_v37 = vld [vmem:[#allocation5 + $0xc] ss:$36 sps:$4 sm:$0xff]   ;;  %v2935_v45 = vld [vmem:[#allocation5 + $0x9c] ss:$36 sps:$4 sm:$0xff]   ;;  %v2948_v48 = vld [vmem:[#allocation5 + $0xe4] ss:$36 sps:$4 sm:$0xff]  }
  0x47   :  { %517 = vmatprep.subr.bf16.mxu1 %v2854_v17  ;;  %599 = vmatprep.subr.bf16.mxu0 %v2858_v18  ;;  %v2911_v38 = vld [vmem:[#allocation5 + $0x8] ss:$36 sps:$4 sm:$0xff]   ;;  %v2929_v43 = vld [vmem:[#allocation5 + $0x50] ss:$36 sps:$4 sm:$0xff]   ;;  %v2940_v46 = vld [vmem:[#allocation5 + $0x98] ss:$36 sps:$4 sm:$0xff]  }
  0x48   :  { %v2931_v44 = vld [vmem:[#allocation5 + $0x68] ss:$36 sps:$4 sm:$0xff]   ;;  %v2944_v47 = vld [vmem:[#allocation5 + $0xb0] ss:$36 sps:$4 sm:$0xff]   ;;  %v2950_v49 = vld [vmem:[#allocation5 + $0xe0] ss:$36 sps:$4 sm:$0xff]  }
  0x49   :  { %v2954_v50 = vld [vmem:[#allocation5 + $0xf8] ss:$36 sps:$4 sm:$0xff]   ;;  %v2958_v51 = vld [vmem:[#allocation5 + $0x12c] ss:$36 sps:$4 sm:$0xff]   ;;  %v2964_v53 = vld [vmem:[#allocation5 + $0x140] ss:$36 sps:$4 sm:$0xff]  }
  0x4a   :  { %518 = vmatpush1.bf16.msra.mxu1 %v2860_v19  ;;  %600 = vmatpush1.bf16.msra.mxu0 %v2862_v20  ;;  %4114 = vst [vmem:[#allocation22_spill] sm:$0xff] %v2954_v50  ;;  %v2960_v52 = vld [vmem:[#allocation5 + $0x128] ss:$36 sps:$4 sm:$0xff]   ;;  %4115 = vst [vmem:[#allocation23_spill] sm:$0xff] %v2964_v53  ;;  %v2968_v54 = vld [vmem:[#allocation5 + $0x174] ss:$36 sps:$4 sm:$0xff]  }
  0x4b   :  { %519 = vmatprep.subr.bf16.mxu1 %v2866_v21  ;;  %601 = vmatprep.subr.bf16.mxu0 %v2870_v22  ;;  %v2972_v55 = vld [vmem:[#allocation5 + $0x170] ss:$36 sps:$4 sm:$0xff]   ;;  %v2974_v56 = vld [vmem:[#allocation5 + $0x188] ss:$36 sps:$4 sm:$0xff]   ;;  %v2978_v57 = vld [vmem:[#allocation5 + $0x1bc] ss:$36 sps:$4 sm:$0xff]  }
  0x4c   :  { %4116 = vst [vmem:[#allocation24_spill] sm:$0xff] %v2974_v56  ;;  %v2982_v58 = vld [vmem:[#allocation5 + $0x1b8] ss:$36 sps:$4 sm:$0xff]   ;;  %v2984_v59 = vld [vmem:[#allocation5 + $0x1d0] ss:$36 sps:$4 sm:$0xff]   ;;  %4119 = vst [vmem:[#allocation27_spill] sm:$0xff] %v3002_v33 }
  0x4d   :  { %4117 = vst [vmem:[#allocation25_spill] sm:$0xff] %v2984_v59  ;;  %v2988_v60 = vld [vmem:[#allocation5 + $0x204] ss:$36 sps:$4 sm:$0xff]   ;;  %v2994_v62 = vld [vmem:[#allocation5 + $0x218] ss:$36 sps:$4 sm:$0xff]  }
  0x4e   :  { %520 = vmatpush1.bf16.msra.mxu1 %v2872_v23  ;;  %602 = vmatpush1.bf16.msra.mxu0 %v2876_v24  ;;  %v2992_v61 = vld [vmem:[#allocation5 + $0x200] ss:$36 sps:$4 sm:$0xff]   ;;  %4118 = vst [vmem:[#allocation26_spill] sm:$0xff] %v2994_v62  ;;  %v3020_v28 = vld [vmem:[#allocation5 + $0xac] ss:$36 sps:$4 sm:$0xff]  }
  0x4f   :  { %521 = vmatprep.subr.bf16.mxu1 %v2878_v25  ;;  %603 = vmatprep.subr.bf16.mxu0 %v2882_v26  ;;  %v2998_v63 = vld [vmem:[#allocation5 + $0x1c] ss:$36 sps:$4 sm:$0xff]   ;;  %v3026_v33 = vld [vmem:[#allocation5 + $0xa8] ss:$36 sps:$4 sm:$0xff]  }
  0x50   :  { %v3016_v35 = vld [vmem:[#allocation5 + $0x60] ss:$36 sps:$4 sm:$0xff]  }
  0x52   :  { %522 = vmatpush1.bf16.msra.mxu1 %v2884_v27  ;;  %604 = vmatpush1.bf16.msra.mxu0 %v2886_v29 }
  0x53   :  { %523 = vmatprep.subr.bf16.mxu1 %v2892_v31  ;;  %605 = vmatprep.subr.bf16.mxu0 %v2896_v32 }
  0x56   :  { %524 = vmatpush1.bf16.msra.mxu1 %v2899_v34  ;;  %606 = vmatpush1.bf16.msra.mxu0 %v2905_v36 }
  0x57   :  { %550 = vmatprep.subr.bf16.mxu1 %v2909_v37  ;;  %2348 = vmatprep.subr.bf16.mxu0 %v4079_v41 }
  0x59   :  { %542 = vmatmul.mubr.bf16.vlgmr.msra.gmra.mrb[0].mxu1 %v2915_v39  ;;  %624 = vmatmul.mubr.bf16.vlgmr.msra.gmra.mrb[0].mxu0 %v2915_v39 }
  0x5a   :  { %551 = vmatpush1.bf16.msra.mxu1 %v2911_v38  ;;  %2349 = vmatpush3.bf16.msra.mxu0 %v2919_v40 }
  0x5b   :  { %552 = vmatprep.subr.bf16.mxu1 %v2923_v42  ;;  %2350 = vmatprep.subr.bf16.mxu0 %v4079_v41 }
  0x5c   :  { %582 = vmatprep.mubr.bf16.mxu1 %v4075_v0  ;;  %2364 = vmatprep.mubr.msk.bf16.mxu0 %vm2739_vm0, %v4079_v41  ;;  %v3006_v0 = vld [vmem:[#allocation5 + $0x18] ss:$36 sps:$4 sm:$0xff]  }
  0x5e   :  { %553 = vmatpush1.bf16.msra.mxu1 %v2929_v43  ;;  %2351 = vmatpush3.bf16.msra.mxu0 %v2931_v44 }
  0x5f   :  { %554 = vmatprep.subr.bf16.mxu1 %v2935_v45  ;;  %2352 = vmatprep.subr.bf16.mxu0 %v4079_v41 }
  0x62   :  { %555 = vmatpush1.bf16.msra.mxu1 %v2940_v46  ;;  %2353 = vmatpush3.bf16.msra.mxu0 %v2944_v47 }
  0x63   :  { %556 = vmatprep.subr.bf16.mxu1 %v2948_v48  ;;  %2354 = vmatprep.subr.bf16.mxu0 %v4079_v41 }
  0x66   :  { %557 = vmatpush1.bf16.msra.mxu1 %v2950_v49  ;;  %2355 = vmatpush3.bf16.msra.mxu0 %v2954_v50 }
  0x67   :  { %558 = vmatprep.subr.bf16.mxu1 %v2958_v51  ;;  %2356 = vmatprep.subr.bf16.mxu0 %v4079_v41 }
  0x6a   :  { %559 = vmatpush1.bf16.msra.mxu1 %v2960_v52  ;;  %2357 = vmatpush3.bf16.msra.mxu0 %v2964_v53 }
  0x6b   :  { %560 = vmatprep.subr.bf16.mxu1 %v2968_v54  ;;  %2358 = vmatprep.subr.bf16.mxu0 %v4079_v41 }
  0x6e   :  { %561 = vmatpush1.bf16.msra.mxu1 %v2972_v55  ;;  %2359 = vmatpush3.bf16.msra.mxu0 %v2974_v56 }
  0x6f   :  { %562 = vmatprep.subr.bf16.mxu1 %v2978_v57  ;;  %2360 = vmatprep.subr.bf16.mxu0 %v4079_v41 }
  0x72   :  { %563 = vmatpush1.bf16.msra.mxu1 %v2982_v58  ;;  %2361 = vmatpush3.bf16.msra.mxu0 %v2984_v59  ;;  %v3010_v59 = vld [vmem:[#allocation5 + $0x64] ss:$36 sps:$4 sm:$0xff]  }
  0x73   :  { %564 = vmatprep.subr.bf16.mxu1 %v2988_v60  ;;  %2362 = vmatprep.subr.bf16.mxu0 %v4079_v41  ;;  %v4120_v41 = vmov 0  }
  0x76   :  { %565 = vmatpush1.bf16.msra.mxu1 %v2992_v61  ;;  %2363 = vmatpush3.bf16.msra.mxu0 %v2994_v62 }
  0x77   :  { %632 = vmatprep.subr.bf16.mxu1 %v2998_v63  ;;  %713 = vmatprep.subr.bf16.mxu0 %v2810_v1  ;;  %v3038_v1 = vld [vmem:[#allocation5 + $0x13c] ss:$36 sps:$4 sm:$0xff]  }
  0x79   :  { %583 = vmatmul.mubr.bf16.vlgmr.msra.gmra.mrb[4].mxu1 %v2915_v39  ;;  %2365 = vmatmul.mubr.bf16.vlgmr.msra.gmra.mrb[4].mxu0 %v2915_v39 }
  0x7a   :  { %633 = vmatpush1.bf16.msra.mxu1 %v3006_v0  ;;  %714 = vmatpush1.bf16.msra.mxu0 %v2815_v3  ;;  %v3030_v3 = vld [vmem:[#allocation5 + $0xf4] ss:$36 sps:$4 sm:$0xff]  }
  0x7b   :  { %634 = vmatprep.subr.bf16.mxu1 %v3010_v59  ;;  %715 = vmatprep.subr.bf16.mxu0 %v2820_v5  ;;  %v3034_v5 = vld [vmem:[#allocation5 + $0xf0] ss:$36 sps:$4 sm:$0xff]  }
  0x7c   :  { %664 = vmatprep.mubr.bf16.mxu1 %v4120_v41  ;;  %745 = vmatprep.mubr.bf16.mxu0 %v4120_v41 }
  0x7e   :  { %635 = vmatpush1.bf16.msra.mxu1 %v3016_v35  ;;  %716 = vmatpush1.bf16.msra.mxu0 %v2826_v7  ;;  %v3042_v7 = vld [vmem:[#allocation5 + $0x138] ss:$36 sps:$4 sm:$0xff]  }
  0x7f   :  { %636 = vmatprep.subr.bf16.mxu1 %v3020_v28  ;;  %717 = vmatprep.subr.bf16.mxu0 %v2832_v9  ;;  %v3046_v9 = vld [vmem:[#allocation5 + $0x184] ss:$36 sps:$4 sm:$0xff]  }
  0x82   :  { %637 = vmatpush1.bf16.msra.mxu1 %v3026_v33  ;;  %718 = vmatpush1.bf16.msra.mxu0 %v2836_v11  ;;  %v3050_v11 = vld [vmem:[#allocation5 + $0x180] ss:$36 sps:$4 sm:$0xff]  }
  0x83   :  { %638 = vmatprep.subr.bf16.mxu1 %v3030_v3  ;;  %719 = vmatprep.subr.bf16.mxu0 %v2842_v13  ;;  %v3054_v13 = vld [vmem:[#allocation5 + $0x1cc] ss:$36 sps:$4 sm:$0xff]  }
  0x86   :  { %639 = vmatpush1.bf16.msra.mxu1 %v3034_v5  ;;  %720 = vmatpush1.bf16.msra.mxu0 %v2848_v15  ;;  %v3058_v15 = vld [vmem:[#allocation5 + $0x1c8] ss:$36 sps:$4 sm:$0xff]  }
  0x87   :  { %640 = vmatprep.subr.bf16.mxu1 %v3038_v1  ;;  %721 = vmatprep.subr.bf16.mxu0 %v2854_v17  ;;  %v3062_v17 = vld [vmem:[#allocation5 + $0x214] ss:$36 sps:$4 sm:$0xff]  }
  0x8a   :  { %641 = vmatpush1.bf16.msra.mxu1 %v3042_v7  ;;  %722 = vmatpush1.bf16.msra.mxu0 %v2860_v19  ;;  %v3066_v19 = vld [vmem:[#allocation5 + $0x210] ss:$36 sps:$4 sm:$0xff]  }
  0x8b   :  { %642 = vmatprep.subr.bf16.mxu1 %v3046_v9  ;;  %723 = vmatprep.subr.bf16.mxu0 %v2866_v21 }
  0x8e   :  { %643 = vmatpush1.bf16.msra.mxu1 %v3050_v11  ;;  %724 = vmatpush1.bf16.msra.mxu0 %v2872_v23 }
  0x8f   :  { %644 = vmatprep.subr.bf16.mxu1 %v3054_v13  ;;  %725 = vmatprep.subr.bf16.mxu0 %v2878_v25 }
  0x92   :  { %645 = vmatpush1.bf16.msra.mxu1 %v3058_v15  ;;  %726 = vmatpush1.bf16.msra.mxu0 %v2884_v27 }
  0x93   :  { %646 = vmatprep.subr.bf16.mxu1 %v3062_v17  ;;  %727 = vmatprep.subr.bf16.mxu0 %v2892_v31 }
  0x96   :  { %647 = vmatpush1.bf16.msra.mxu1 %v3066_v19  ;;  %728 = vmatpush1.bf16.msra.mxu0 %v2899_v34 }
  0x97   :  { %754 = vmatprep.subr.bf16.mxu1 %v2909_v37  ;;  %795 = vmatprep.subr.bf16.mxu0 %v2812_v2 }
  0x99   :  { %665 = vmatmul.mubr.bf16.vlgmr.msra.gmra.mrb[8].mxu1 %v2915_v39  ;;  %746 = vmatmul.mubr.bf16.vlgmr.msra.gmra.mrb[8].mxu0 %v2888_v30  ;;  %v4121_v39 = vmov 0.0  }
  0x9a   :  { %755 = vmatpush1.bf16.msra.mxu1 %v2911_v38  ;;  %796 = vmatpush1.bf16.msra.mxu0 %v2817_v4 }
  0x9b   :  { %756 = vmatprep.subr.bf16.mxu1 %v2923_v42  ;;  %797 = vmatprep.subr.bf16.mxu0 %v2824_v6 }
  0x9c   :  { %786 = vmatprep.mubr.bf16.mxu1 %v4120_v41  ;;  %827 = vmatprep.mubr.bf16.mxu0 %v4120_v41 }
  0x9e   :  { %757 = vmatpush1.bf16.msra.mxu1 %v2929_v43  ;;  %798 = vmatpush1.bf16.msra.mxu0 %v2829_v8 }
  0x9f   :  { %758 = vmatprep.subr.bf16.mxu1 %v2935_v45  ;;  %799 = vmatprep.subr.bf16.mxu0 %v2834_v10 }
  0xa2   :  { %759 = vmatpush1.bf16.msra.mxu1 %v2940_v46  ;;  %800 = vmatpush1.bf16.msra.mxu0 %v2838_v12 }
  0xa3   :  { %760 = vmatprep.subr.bf16.mxu1 %v2948_v48  ;;  %801 = vmatprep.subr.bf16.mxu0 %v2846_v14 }
  0xa6   :  { %761 = vmatpush1.bf16.msra.mxu1 %v2950_v49  ;;  %802 = vmatpush1.bf16.msra.mxu0 %v2852_v16 }
  0xa7   :  { %762 = vmatprep.subr.bf16.mxu1 %v2958_v51  ;;  %803 = vmatprep.subr.bf16.mxu0 %v2858_v18 }
  0xaa   :  { %763 = vmatpush1.bf16.msra.mxu1 %v2960_v52  ;;  %804 = vmatpush1.bf16.msra.mxu0 %v2862_v20 }
  0xab   :  { %764 = vmatprep.subr.bf16.mxu1 %v2968_v54  ;;  %805 = vmatprep.subr.bf16.mxu0 %v2870_v22 }
  0xae   :  { %765 = vmatpush1.bf16.msra.mxu1 %v2972_v55  ;;  %806 = vmatpush1.bf16.msra.mxu0 %v2876_v24 }
  0xaf   :  { %766 = vmatprep.subr.bf16.mxu1 %v2978_v57  ;;  %807 = vmatprep.subr.bf16.mxu0 %v2882_v26 }
  0xb2   :  { %767 = vmatpush1.bf16.msra.mxu1 %v2982_v58  ;;  %808 = vmatpush1.bf16.msra.mxu0 %v2886_v29 }
  0xb3   :  { %768 = vmatprep.subr.bf16.mxu1 %v2988_v60  ;;  %809 = vmatprep.subr.bf16.mxu0 %v2896_v32 }
  0xb6   :  { %769 = vmatpush1.bf16.msra.mxu1 %v2992_v61  ;;  %810 = vmatpush1.bf16.msra.mxu0 %v2905_v36 }
  0xb7   :  { %836 = vmatprep.subr.bf16.mxu1 %v2998_v63  ;;  %2368 = vmatprep.subr.bf16.mxu0 %v4121_v39 }
  0xb9   :  { %787 = vmatmul.mubr.bf16.vlgmr.msra.gmra.mrb[4].mxu1 %v2888_v30  ;;  %828 = vmatmul.mubr.bf16.vlgmr.msra.gmra.mrb[0].mxu0 %v2888_v30 }
  0xba   :  { %837 = vmatpush1.bf16.msra.mxu1 %v3006_v0  ;;  %2369 = vmatpush3.bf16.msra.mxu0 %v2919_v40 }
  0xbb   :  { %838 = vmatprep.subr.bf16.mxu1 %v3010_v59  ;;  %2370 = vmatprep.subr.bf16.mxu0 %v4121_v39 }
  0xbc   :  { %868 = vmatprep.mubr.bf16.mxu1 %v4120_v41  ;;  %2384 = vmatprep.mubr.msk.bf16.mxu0 %vm2739_vm0, %v4121_v39 }
  0xbe   :  { %839 = vmatpush1.bf16.msra.mxu1 %v3016_v35  ;;  %2371 = vmatpush3.bf16.msra.mxu0 %v2931_v44 }
  0xbf   :  { %840 = vmatprep.subr.bf16.mxu1 %v3020_v28  ;;  %2372 = vmatprep.subr.bf16.mxu0 %v4121_v39 }
  0xc2   :  { %841 = vmatpush1.bf16.msra.mxu1 %v3026_v33  ;;  %2373 = vmatpush3.bf16.msra.mxu0 %v2944_v47 }
  0xc3   :  { %842 = vmatprep.subr.bf16.mxu1 %v3030_v3  ;;  %2374 = vmatprep.subr.bf16.mxu0 %v4121_v39 }
  0xc6   :  { %843 = vmatpush1.bf16.msra.mxu1 %v3034_v5  ;;  %2375 = vmatpush3.bf16.msra.mxu0 %v2954_v50  ;;  %v4122_v50 = vld [vmem:[#allocation25_spill] sm:$0xff] }
  0xc7   :  { %844 = vmatprep.subr.bf16.mxu1 %v3038_v1  ;;  %2376 = vmatprep.subr.bf16.mxu0 %v4121_v39 }
  0xca   :  { %845 = vmatpush1.bf16.msra.mxu1 %v3042_v7  ;;  %2377 = vmatpush3.bf16.msra.mxu0 %v2964_v53  ;;  %v4123_v53 = vld [vmem:[#allocation12_spill] sm:$0xff] }
  0xcb   :  { %846 = vmatprep.subr.bf16.mxu1 %v3046_v9  ;;  %2378 = vmatprep.subr.bf16.mxu0 %v4121_v39 }
  0xce   :  { %847 = vmatpush1.bf16.msra.mxu1 %v3050_v11  ;;  %2379 = vmatpush3.bf16.msra.mxu0 %v2974_v56  ;;  %v4124_v56 = vld [vmem:[#allocation13_spill] sm:$0xff] }
  0xcf   :  { %848 = vmatprep.subr.bf16.mxu1 %v3054_v13  ;;  %2380 = vmatprep.subr.bf16.mxu0 %v4121_v39 }
  0xd2   :  { %849 = vmatpush1.bf16.msra.mxu1 %v3058_v15  ;;  %2381 = vmatpush3.bf16.msra.mxu0 %v4122_v50  ;;  %v4125_v50 = vld [vmem:[#allocation14_spill] sm:$0xff] }
  0xd3   :  { %850 = vmatprep.subr.bf16.mxu1 %v3062_v17  ;;  %2382 = vmatprep.subr.bf16.mxu0 %v4121_v39 }
  0xd6   :  { %851 = vmatpush1.bf16.msra.mxu1 %v3066_v19  ;;  %2383 = vmatpush3.bf16.msra.mxu0 %v2994_v62  ;;  %v4126_v62 = vld [vmem:[#allocation15_spill] sm:$0xff] }
  0xd7   :  { %920 = vmatprep.subr.bf16.mxu0 %v4123_v53  ;;  %961 = vmatprep.subr.bf16.mxu1 %v2909_v37  ;;  %v4127_v37 = vld [vmem:[#allocation16_spill] sm:$0xff] }
  0xd9   :  { %869 = vmatmul.mubr.bf16.vlgmr.msra.gmra.mrb[8].mxu1 %v2888_v30  ;;  %2385 = vmatmul.mubr.bf16.vlgmr.msra.gmra.mrb[4].mxu0 %v2888_v30  ;;  %v4128_v30 = vld [vmem:[#allocation17_spill] sm:$0xff] }
  0xda   :  { %921 = vmatpush1.bf16.msra.mxu0 %v4124_v56  ;;  %962 = vmatpush1.bf16.msra.mxu1 %v2911_v38  ;;  %v4129_v38 = vld [vmem:[#allocation18_spill] sm:$0xff] }
  0xdb   :  { %922 = vmatprep.subr.bf16.mxu0 %v4125_v50  ;;  %963 = vmatprep.subr.bf16.mxu1 %v2923_v42  ;;  %v4130_v42 = vld [vmem:[#allocation19_spill] sm:$0xff]  ;;  %v4131_v50 = vld [vmem:[#allocation20_spill] sm:$0xff] }
  0xdc   :  { %952 = vmatprep.mubr.bf16.mxu0 %v4120_v41  ;;  %993 = vmatprep.mubr.bf16.mxu1 %v4120_v41 }
  0xde   :  { %923 = vmatpush1.bf16.msra.mxu0 %v4126_v62  ;;  %964 = vmatpush1.bf16.msra.mxu1 %v2929_v43  ;;  %v4132_v43 = vld [vmem:[#allocation21_spill] sm:$0xff] }
  0xdf   :  { %924 = vmatprep.subr.bf16.mxu0 %v4127_v37  ;;  %965 = vmatprep.subr.bf16.mxu1 %v2935_v45  ;;  %v4133_v45 = vld [vmem:[#allocation27_spill] sm:$0xff] }
  0xe2   :  { %925 = vmatpush1.bf16.msra.mxu0 %v4128_v30  ;;  %966 = vmatpush1.bf16.msra.mxu1 %v2940_v46 }
  0xe3   :  { %926 = vmatprep.subr.bf16.mxu0 %v4129_v38  ;;  %967 = vmatprep.subr.bf16.mxu1 %v2948_v48 }
  0xe6   :  { %927 = vmatpush1.bf16.msra.mxu0 %v4130_v42  ;;  %968 = vmatpush1.bf16.msra.mxu1 %v2950_v49 }
  0xe7   :  { %928 = vmatprep.subr.bf16.mxu0 %v4131_v50  ;;  %969 = vmatprep.subr.bf16.mxu1 %v2958_v51 }
  0xea   :  { %929 = vmatpush1.bf16.msra.mxu0 %v4132_v43  ;;  %970 = vmatpush1.bf16.msra.mxu1 %v2960_v52 }
  0xeb   :  { %930 = vmatprep.subr.bf16.mxu0 %v2866_v21  ;;  %971 = vmatprep.subr.bf16.mxu1 %v2968_v54  ;;  %v919_v21 = vpack.c.bf16 %v4133_v45, %v4133_v45 }
  0xee   :  { %931 = vmatpush1.bf16.msra.mxu0 %v2872_v23  ;;  %972 = vmatpush1.bf16.msra.mxu1 %v2972_v55 }
  0xef   :  { %932 = vmatprep.subr.bf16.mxu0 %v2878_v25  ;;  %973 = vmatprep.subr.bf16.mxu1 %v2978_v57 }
  0xf2   :  { %933 = vmatpush1.bf16.msra.mxu0 %v2884_v27  ;;  %974 = vmatpush1.bf16.msra.mxu1 %v2982_v58 }
  0xf3   :  { %934 = vmatprep.subr.bf16.mxu0 %v2892_v31  ;;  %975 = vmatprep.subr.bf16.mxu1 %v2988_v60 }
  0xf6   :  { %935 = vmatpush1.bf16.msra.mxu0 %v2899_v34  ;;  %976 = vmatpush1.bf16.msra.mxu1 %v2992_v61 }
  0xf7   :  { %1002 = vmatprep.subr.bf16.mxu0 %v2812_v2  ;;  %1043 = vmatprep.subr.bf16.mxu1 %v2998_v63 }
  0xf9   :  { %953 = vmatmul.mubr.bf16.vlgmr.msra.gmra.mrb[8].mxu0 %v919_v21  ;;  %994 = vmatmul.mubr.bf16.vlgmr.msra.gmra.mrb[4].mxu1 %v919_v21 }
  0xfa   :  { %1003 = vmatpush1.bf16.msra.mxu0 %v2817_v4  ;;  %1044 = vmatpush1.bf16.msra.mxu1 %v3006_v0  ;;  %v4134_v0 = vld [vmem:[#allocation22_spill] sm:$0xff]  ;;  %v4136_v4 = vld [vmem:[#allocation24_spill] sm:$0xff] }
  0xfb   :  { %1004 = vmatprep.subr.bf16.mxu0 %v2824_v6  ;;  %1045 = vmatprep.subr.bf16.mxu1 %v3010_v59 }
  0xfc   :  { %1034 = vmatprep.mubr.bf16.mxu0 %v4120_v41  ;;  %1075 = vmatprep.mubr.bf16.mxu1 %v4120_v41 }
  0xfe   :  { %1005 = vmatpush1.bf16.msra.mxu0 %v2829_v8  ;;  %1046 = vmatpush1.bf16.msra.mxu1 %v3016_v35  ;;  %v4138_v8 = vld [vmem:[#allocation26_spill] sm:$0xff] }
  0xff   :  { %1006 = vmatprep.subr.bf16.mxu0 %v2834_v10  ;;  %1047 = vmatprep.subr.bf16.mxu1 %v3020_v28 }
 0x102   :  { %1007 = vmatpush1.bf16.msra.mxu0 %v2838_v12  ;;  %1048 = vmatpush1.bf16.msra.mxu1 %v3026_v33  ;;  %v3238_v12 = vld [vmem:[#allocation7] sm:$0xff] }
 0x103   :  { %1008 = vmatprep.subr.bf16.mxu0 %v2846_v14  ;;  %1049 = vmatprep.subr.bf16.mxu1 %v3030_v3 }
 0x106   :  { %1009 = vmatpush1.bf16.msra.mxu0 %v2852_v16  ;;  %1050 = vmatpush1.bf16.msra.mxu1 %v3034_v5 }
 0x107   :  { %1010 = vmatprep.subr.bf16.mxu0 %v2858_v18  ;;  %1051 = vmatprep.subr.bf16.mxu1 %v3038_v1  ;;  %v4135_v1 = vld [vmem:[#allocation23_spill] sm:$0xff] }
 0x10a   :  { %1011 = vmatpush1.bf16.msra.mxu0 %v2862_v20  ;;  %1052 = vmatpush1.bf16.msra.mxu1 %v3042_v7  ;;  %v4137_v7 = vld [vmem:[#allocation25_spill] sm:$0xff] }
 0x10b   :  { %1012 = vmatprep.subr.bf16.mxu0 %v2870_v22  ;;  %1053 = vmatprep.subr.bf16.mxu1 %v3046_v9  ;;  %v1137_v9 = vlaneseq }
 0x10d   :  { %v3235_v10 = vshrl.u32 %v1137_v9, 7 }
 0x10e   :  { %1013 = vmatpush1.bf16.msra.mxu0 %v2876_v24  ;;  %1054 = vmatpush1.bf16.msra.mxu1 %v3050_v11 }
 0x10f   :  { %1014 = vmatprep.subr.bf16.mxu0 %v2882_v26  ;;  %1055 = vmatprep.subr.bf16.mxu1 %v3054_v13  ;;  %v1147_v11 = vsub.s32 2, %v3235_v10  ;;  %v3241_v13 = vsub.s32 0, %v3235_v10  ;;  %v4098_v14 = vsub.s32 1, %v3235_v10  ;;  %v4097_v49 = vsub.s32 3, %v3235_v10 }
 0x110   :  { %v4096_v35 = vsub.s32 4, %v3235_v10  ;;  %v4095_v28 = vsub.s32 6, %v3235_v10 }
 0x111   :  { %v1140_v16 = vrot.slane %v3238_v12, %v3241_v13  ;;  %v1152_v59 = vrot.slane %v3238_v12, %v4097_v49 }
 0x112   :  { %1015 = vmatpush1.bf16.msra.mxu0 %v2886_v29  ;;  %1056 = vmatpush1.bf16.msra.mxu1 %v3058_v15  ;;  %v1148_v15 = vrot.slane %v3238_v12, %v1147_v11 }
 0x113   :  { %1016 = vmatprep.subr.bf16.mxu0 %v2896_v32  ;;  %1057 = vmatprep.subr.bf16.mxu1 %v3062_v17 }
 0x116   :  { %1017 = vmatpush1.bf16.msra.mxu0 %v2905_v36  ;;  %1058 = vmatpush1.bf16.msra.mxu1 %v3066_v19  ;;  %v1144_v19 = vrot.slane %v3238_v12, %v4098_v14 }
 0x117   :  { %2388 = vmatprep.subr.bf16.mxu0 %v4121_v39 }
 0x119   :  { %1035 = vmatmul.mubr.bf16.vlgmr.msra.gmra.mrb[0].mxu0 %v919_v21  ;;  %1076 = vmatmul.mubr.bf16.vlgmr.msra.gmra.mrb[8].mxu1 %v919_v21 }
 0x11a   :  { %2389 = vmatpush3.bf16.msra.mxu0 %v2919_v40  ;;  %2404 = vmatprep.mubr.msk.bf16.mxu0 %vm2739_vm0, %v4121_v39 }
 0x11b   :  { %2390 = vmatprep.subr.bf16.mxu0 %v4121_v39 }
 0x11e   :  { %2391 = vmatpush3.bf16.msra.mxu0 %v2931_v44 }
 0x11f   :  { %2392 = vmatprep.subr.bf16.mxu0 %v4121_v39 }
 0x122   :  { %2393 = vmatpush3.bf16.msra.mxu0 %v2944_v47 }
 0x123   :  { %2394 = vmatprep.subr.bf16.mxu0 %v4121_v39 }
 0x126   :  { %2395 = vmatpush3.bf16.msra.mxu0 %v4134_v0 }
 0x127   :  { %2396 = vmatprep.subr.bf16.mxu0 %v4121_v39 }
 0x12a   :  { %2397 = vmatpush3.bf16.msra.mxu0 %v4135_v1  ;;  %v2740_v1 = vmov 683565275  }
 0x12b   :  { %2398 = vmatprep.subr.bf16.mxu0 %v4121_v39 }
 0x12c   :  { %v543_v2 = vpop.f32.mrb[0].mxu1 }
 0x12d   :  { %v545_v3 = vpop.f32.mrb[1].mxu1 }
 0x12e   :  { %2399 = vmatpush3.bf16.msra.mxu0 %v4136_v4  ;;  %v547_v5 = vpop.f32.mrb[2].mxu1 }
 0x12f   :  { %2400 = vmatprep.subr.bf16.mxu0 %v4121_v39  ;;  %v548_v6 = vpop.f32.mrb[3].mxu1 }
 0x130   :  { %v2741_v6 = vmov 2475754826  }
 0x132   :  { %2401 = vmatpush3.bf16.msra.mxu0 %v4137_v7 }
 0x133   :  { %2402 = vmatprep.subr.bf16.mxu0 %v4121_v39 }
 0x136   :  { %2403 = vmatpush3.bf16.msra.mxu0 %v4138_v8  ;;  %v4102_v8 = vmov 2131351028  }
 0x139   :  { %2405 = vmatmul.mubr.bf16.vlgmr.msra.gmra.mrb[4].mxu0 %v919_v21 }
 0x1cc   :  { %v954_v17 = vpop.f32.mrb[8].mxu0  ;;  %v3249_v18 = vpop.f32.mrb[4].mxu1 }
 0x1cd   :  { %v3254_v20 = vadd.f32 %v954_v17, %v543_v2  ;;  %v3257_v22 = vadd.f32 %v1148_v15, %v3249_v18  ;;  %v956_v23 = vpop.f32.mrb[9].mxu0  ;;  %v3259_v24 = vpop.f32.mrb[5].mxu1  ;;  %v4100_v17 = vmov 2102212464  }
 0x1ce   :  { %v3261_v25 = vadd.f32 %v956_v23, %v545_v3  ;;  %v958_v26 = vpop.f32.mrb[10].mxu0  ;;  %v999_v27 = vpop.f32.mrb[6].mxu1  ;;  %v3290_v38 = vadd.f32 %v1152_v59, %v3259_v24  ;;  %v2744_v23 = vmov 920167782  }
 0x1cf   :  { %v3264_v29 = vadd.f32 %v3254_v20, %v1140_v16  ;;  %v1399_v31 = vand.u32 2147483647, %v3257_v22  ;;  %v1402_v32 = vand.u32 2139095040, %v3257_v22  ;;  %v959_v34 = vpop.f32.mrb[11].mxu0  ;;  %v1000_v36 = vpop.f32.mrb[7].mxu1 }
 0x1d0   :  { %v3269_v40 = vadd.f32 %v3261_v25, %v1144_v19 }
 0x1d1   :  { %v1191_v44 = vand.u32 2147483647, %v3264_v29  ;;  %v1194_v46 = vand.u32 2139095040, %v3264_v29  ;;  %v1403_v47 = vshrl.u32 %v1402_v32, 23  ;;  %v1406_v48 = vand.u32 8388607, %v1399_v31 }
 0x1d2   :  { %v1298_v53 = vand.u32 2139095040, %v3269_v40  ;;  %v1295_v62 = vand.u32 2147483647, %v3269_v40  ;;  %vm1193_vm15 = vcmp.lt.s32.totalorder %v3264_v29, 0 }
 0x1d3   :  { %v1195_v51 = vshrl.u32 %v1194_v46, 23  ;;  %v1198_v52 = vand.u32 8388607, %v1191_v44  ;;  %v2293_v54 = vadd.s32 4294967169, %v1403_v47  ;;  %v1407_v57 = vor.u32 8388608, %v1406_v48 }
 0x1d4   :  { %v1299_v56 = vshrl.u32 %v1298_v53, 23  ;;  %v3296_v45 = vand.u32 8388607, %v1295_v62  ;;  %v2745_v47 = vmov 1326507024  }
 0x1d5   :  { %v2285_v55 = vadd.s32 4294967169, %v1195_v51  ;;  %v1409_v58 = vadd.s32 1, %v2293_v54  ;;  %v1199_v60 = vor.u32 8388608, %v1198_v52  ;;  %v3287_v30 = vshll.u32 %v1407_v57, 8 }
 0x1d6   :  { %v2289_v63 = vadd.s32 4294967169, %v1299_v56  ;;  %vm3442_vm0 = vcmp.le.f32.partialorder %v1191_v44, 0.7853982 }
 0x1d7   :  { %v1201_v61 = vadd.s32 1, %v2285_v55  ;;  %vm1410_vm1 = vcmp.gt.s32.totalorder %v1409_v58, 0  ;;  %v3292_v43 = vshll.u32 %v1199_v60, 8 }
 0x1d8   :  { %v1411_v33 = vsel %vm1410_vm1, %v1409_v58, 0  ;;  %v3303_v3 = vadd.s32 1, %v2289_v63  ;;  %v2127_v63 = vld [vmem:[%s4073_s3] sm:$0xff] }
 0x1d9   :  { %vm1202_vm2 = vcmp.gt.s32.totalorder %v1201_v61, 0  ;;  %v3285_v37 = vand.u32 31, %v1411_v33  ;;  %v3298_v21 = vshrl.u32 %v1411_v33, 5  ;;  %vm2129_vm8 = vcmp.gt.f32.partialorder %v2127_v63, 0.5 }
 0x1da   :  { %v1203_v39 = vsel %vm1202_vm2, %v1201_v61, 0  ;;  %vm1306_vm6 = vcmp.gt.s32.totalorder %v3303_v3, 0 }
 0x1db   :  { %v1204_v42 = vshrl.u32 %v1203_v39, 5  ;;  %v1205_v50 = vand.u32 31, %v1203_v39  ;;  %v1414_v0 = vsub.s32 32, %v3285_v37  ;;  %v1416_v2 = vshll.u32 %v2740_v1, %v3285_v37 }
 0x1dc   :  { %v1419_v7 = vshll.u32 %v2741_v6, %v3285_v37  ;;  %v1422_v9 = vshll.u32 %v4102_v8, %v3285_v37  ;;  %vm1431_vm9 = vcmp.lt.s32.totalorder %v3298_v21, 1  ;;  %vm1432_vm10 = vcmp.lt.s32.totalorder %v3298_v21, 2 }
 0x1dd   :  { %v1206_v4 = vsub.s32 32, %v1205_v50  ;;  %v1208_v5 = vshll.u32 %v2740_v1, %v1205_v50  ;;  %v1211_v15 = vshll.u32 %v2741_v6, %v1205_v50  ;;  %v1214_v16 = vshll.u32 %v4102_v8, %v1205_v50 }
 0x1de   :  { %v1217_v19 = vshll.u32 %v4100_v17, %v1205_v50  ;;  %v1220_v26 = vshll.u32 %v2744_v23, %v1205_v50  ;;  %vm1223_vm3 = vcmp.lt.s32.totalorder %v1204_v42, 1  ;;  %vm1225_vm4 = vcmp.lt.s32.totalorder %v1204_v42, 3 }
 0x1df   :  { %v1209_v27 = vshrl.u32 %v2741_v6, %v1206_v4  ;;  %v1212_v32 = vshrl.u32 %v4102_v8, %v1206_v4  ;;  %v1215_v34 = vshrl.u32 %v4100_v17, %v1206_v4  ;;  %v1207_v36 = vshrl.u32 %v2740_v1, %v1206_v4 }
 0x1e0   :  { %v1218_v46 = vshrl.u32 %v2744_v23, %v1206_v4  ;;  %v1221_v48 = vshrl.u32 %v2745_v47, %v1206_v4  ;;  %vm1226_vm5 = vcmp.lt.s32.totalorder %v1204_v42, 4  ;;  %v1417_v56 = vshrl.u32 %v2741_v6, %v1414_v0 }
 0x1e1   :  { %v1210_v51 = vor.u32 %v1209_v27, %v1208_v5  ;;  %v1213_v52 = vor.u32 %v1212_v32, %v1211_v15  ;;  %v1216_v53 = vor.u32 %v1215_v34, %v1214_v16  ;;  %v1420_v57 = vshrl.u32 %v4102_v8, %v1414_v0 }
 0x1e2   :  { %v1219_v54 = vor.u32 %v1218_v46, %v1217_v19  ;;  %v1222_v55 = vor.u32 %v1221_v48, %v1220_v26  ;;  %vm1224_vm7 = vcmp.lt.s32.totalorder %v1204_v42, 2  ;;  %v1418_v16 = vor.u32 %v1417_v56, %v1416_v2 }
 0x1e3   :  { %v1227_v58 = vsel %vm1223_vm3, %v1207_v36, %v1210_v51  ;;  %v1228_v59 = vsel %vm1226_vm5, %v1216_v53, 2102212464  ;;  %v1231_v60 = vsel %vm1223_vm3, %v1210_v51, %v1213_v52  ;;  %v1235_v61 = vsel %vm1223_vm3, %v1213_v52, %v1216_v53 }
 0x1e4   :  { %v1229_v33 = vsel %vm1225_vm4, %v1213_v52, %v1228_v59  ;;  %v1232_v39 = vsel %vm1226_vm5, %v1219_v54, 920167782  ;;  %v1236_v50 = vsel %vm1226_vm5, %v1222_v55, 1326507024  ;;  %v1421_v27 = vor.u32 %v1420_v57, %v1419_v7 }
 0x1e5   :  { %v1230_v4 = vsel %vm1224_vm7, %v1227_v58, %v1229_v33  ;;  %v1233_v5 = vsel %vm1225_vm4, %v1216_v53, %v1232_v39  ;;  %v1237_v15 = vsel %vm1225_vm4, %v1219_v54, %v1236_v50  ;;  %v1423_v32 = vshrl.u32 %v4100_v17, %v1414_v0 }
 0x1e6   :  { %v1234_v19 = vsel %vm1224_vm7, %v1231_v60, %v1233_v5  ;;  %v1238_v26 = vsel %vm1224_vm7, %v1235_v61, %v1237_v15  ;;  %v1415_v51 = vshrl.u32 %v2740_v1, %v1414_v0  ;;  %v1425_v2 = vshll.u32 %v4100_v17, %v3285_v37 }
 0x1e7   :  { %v3334_v34 = vmul.u32.u64.low %v3292_v43, %v1238_v26  ;;  %v3335_v36 = vmul.u32.u64.high %v3292_v43, %v1238_v26, %v3334_v34  ;;  %v3338_v46 = vmul.u32.u64.low %v3292_v43, %v1234_v19  ;;  %v3339_v48 = vmul.u32.u64.high %v3292_v43, %v1234_v19, %v3338_v46 }
 0x1e8   :  { %v1424_v42 = vor.u32 %v1423_v32, %v1422_v9  ;;  %v1426_v52 = vshrl.u32 %v2744_v23, %v1414_v0  ;;  %v1246_v7 = vmul.u32 %v3292_v43, %v1230_v4  ;;  %v1428_v53 = vshll.u32 %v2744_v23, %v3285_v37 }
 0x1e9   :  { %v1429_v54 = vshrl.u32 %v2745_v47, %v1414_v0  ;;  %vm1433_vm11 = vcmp.lt.s32.totalorder %v3298_v21, 3  ;;  %vm1434_vm12 = vcmp.lt.s32.totalorder %v3298_v21, 4  ;;  %vm1248_vm13 = vc.u32 %v3335_v36, %v3338_v46 }
 0x1ea   :  { %v1427_v55 = vor.u32 %v1426_v52, %v1425_v2  ;;  %v1249_v9 = vadd.s32 1, %v3339_v48  ;;  %v1439_v56 = vsel %vm1431_vm9, %v1418_v16, %v1421_v27  ;;  %v1435_v57 = vsel %vm1431_vm9, %v1415_v51, %v1418_v16 }
 0x1eb   :  { %v1430_v43 = vor.u32 %v1429_v54, %v1428_v53  ;;  %v1436_v37 = vsel %vm1434_vm12, %v1424_v42, 2102212464  ;;  %v1443_v0 = vsel %vm1431_vm9, %v1421_v27, %v1424_v42  ;;  %v1307_v39 = vsel %vm1306_vm6, %v3303_v3, 0 }
 0x1ec   :  { %v1440_v58 = vsel %vm1434_vm12, %v1427_v55, 920167782  ;;  %v3357_v59 = vpop.f32.mrb[0].mxu0  ;;  %v1250_v60 = vsel %vm1248_vm13, %v1249_v9, %v3339_v48  ;;  %v3365_v50 = vpop.f32.mrb[8].mxu1  ;;  %v1437_v15 = vsel %vm1433_vm11, %v1421_v27, %v1436_v37  ;;  %v1506_v51 = vand.u32 2139095040, %v3290_v38 }
 0x1ed   :  { %v1441_v61 = vsel %vm1433_vm11, %v1424_v42, %v1440_v58  ;;  %v1444_v33 = vsel %vm1434_vm12, %v1430_v43, 1326507024  ;;  %v3367_v4 = vpop.f32.mrb[1].mxu0  ;;  %v1251_v5 = vadd.s32 %v1250_v60, %v1246_v7  ;;  %v3375_v26 = vpop.f32.mrb[9].mxu1  ;;  %v3391_v54 = vsel %vm2129_vm8, 1, %v4120_v41 }
 0x1ee   :  { %v1442_v16 = vsel %vm1432_vm10, %v1439_v56, %v1441_v61  ;;  %v1445_v19 = vsel %vm1433_vm11, %v1427_v55, %v1444_v33  ;;  %v1040_v32 = vpop.f32.mrb[2].mxu0  ;;  %v1081_v27 = vpop.f32.mrb[10].mxu1  ;;  %v1438_v55 = vsel %vm1432_vm10, %v1435_v57, %v1437_v15  ;;  %v1303_v9 = vor.u32 8388608, %v3296_v45 }
 0x1ef   :  { %v1446_v3 = vsel %vm1432_vm10, %v1443_v0, %v1445_v19  ;;  %v3380_v34 = vmul.u32.u64.low %v3287_v30, %v1442_v16  ;;  %v3381_v48 = vmul.u32.u64.high %v3287_v30, %v1442_v16, %v3380_v34  ;;  %v1041_v42 = vpop.f32.mrb[3].mxu0  ;;  %v1252_v2 = vadd.s32 536870912, %v1251_v5  ;;  %v1082_v53 = vpop.f32.mrb[11].mxu1 }
 0x1f0   :  { %v3386_v52 = vmul.u32.u64.low %v3287_v30, %v1446_v3  ;;  %v3387_v7 = vmul.u32.u64.high %v3287_v30, %v1446_v3, %v3386_v52  ;;  %v1309_v43 = vand.u32 31, %v1307_v39  ;;  %v2136_v37 = vrot.slane %v3391_v54, %v3241_v13 }
 0x1f1   :  { %v1253_v56 = vshrl.u32 %v1252_v2, 30  ;;  %v3401_v58 = vrot.slane %v3238_v12, %v4096_v35  ;;  %v1457_v0 = vadd.s32 1, %v3381_v48  ;;  %v1507_v60 = vshrl.u32 %v1506_v51, 23 }
 0x1f2   :  { %v1310_v63 = vsub.s32 32, %v1309_v43  ;;  %v3407_v21 = vrot.slane %v3238_v12, %v4095_v28  ;;  %v1454_v57 = vmul.u32 %v3287_v30, %v1438_v55  ;;  %vm1456_vm14 = vc.u32 %v3387_v7, %v3380_v34 }
 0x1f3   :  { %v1254_v45 = vshll.u32 %v1253_v56, 30  ;;  %v3415_v61 = vrot.slane %v3391_v54, %v1147_v11  ;;  %v1458_v33 = vsel %vm1456_vm14, %v1457_v0, %v3381_v48  ;;  %v3419_v16 = vshll.u32 %v1303_v9, 8 }
 0x1f4   :  { %v1313_v15 = vshrl.u32 %v2741_v6, %v1310_v63  ;;  %v4099_v19 = vand.u32 2147483647, %v3290_v38  ;;  %v1459_v3 = vadd.s32 %v1458_v33, %v1454_v57  ;;  %v1312_v30 = vshll.u32 %v2740_v1, %v1309_v43 }
 0x1f5   :  { %v3422_v32 = vsub.s32 %v1251_v5, %v1254_v45  ;;  %v1316_v51 = vshrl.u32 %v4102_v8, %v1310_v63  ;;  %v3427_v27 = vshrl.u32 %v1307_v39, 5  ;;  %v1315_v11 = vshll.u32 %v2741_v6, %v1309_v43 }
 0x1f6   :  { %v1319_v48 = vshrl.u32 %v4100_v17, %v1310_v63  ;;  %v2297_v42 = vadd.s32 4294967169, %v1507_v60  ;;  %v1460_v52 = vadd.s32 536870912, %v1459_v3  ;;  %v1314_v53 = vor.u32 %v1313_v15, %v1312_v30 }
 0x1f7   :  { %v1257_v2 = vsub.s32 0, %v3422_v32  ;;  %v1318_v5 = vshll.u32 %v4102_v8, %v1309_v43  ;;  %v1321_v55 = vshll.u32 %v4100_v17, %v1309_v43  ;;  %v1322_v9 = vshrl.u32 %v2744_v23, %v1310_v63 }
 0x1f8   :  { %v1324_v0 = vshll.u32 %v2744_v23, %v1309_v43  ;;  %v1325_v39 = vshrl.u32 %v2745_v47, %v1310_v63  ;;  %v1461_v57 = vshrl.u32 %v1460_v52, 30  ;;  %v1317_v33 = vor.u32 %v1316_v51, %v1315_v11 }
 0x1f9   :  { %v2286_v45 = vmin.u32 %v1257_v2, %v3422_v32  ;;  %v1320_v28 = vor.u32 %v1319_v48, %v1318_v5  ;;  %v1247_v60 = vadd.s32 %v3338_v46, %v3335_v36  ;;  %v1323_v35 = vor.u32 %v1322_v9, %v1321_v55 }
 0x1fa   :  { %v1326_v15 = vor.u32 %v1325_v39, %v1324_v0  ;;  %v1513_v30 = vadd.s32 1, %v2297_v42  ;;  %v1277_v14 = vsub.s32 4, %v1253_v56  ;;  %vm1327_vm1 = vcmp.lt.s32.totalorder %v3427_v27, 1 }
 0x1fb   :  { %v1259_v43 = vclz %v2286_v45  ;;  %vm1328_vm2 = vcmp.lt.s32.totalorder %v3427_v27, 2  ;;  %v1462_v51 = vshll.u32 %v1461_v57, 30  ;;  %v1311_v11 = vshrl.u32 %v2740_v1, %v1310_v63 }
 0x1fc   :  { %vm1329_vm3 = vcmp.lt.s32.totalorder %v3427_v27, 3  ;;  %vm1330_vm4 = vcmp.lt.s32.totalorder %v3427_v27, 4  ;;  %v1335_v44 = vsel %vm1327_vm1, %v1314_v53, %v1317_v33  ;;  %v1339_v48 = vsel %vm1327_vm1, %v1317_v33, %v1320_v28 }
 0x1fd   :  { %v2287_v36 = vadd.s32 4294967294, %v1259_v43  ;;  %v1336_v46 = vsel %vm1330_vm4, %v1323_v35, 920167782  ;;  %v3455_v42 = vsub.s32 %v1459_v3, %v1462_v51  ;;  %v1332_v2 = vsel %vm1330_vm4, %v1320_v28, 2102212464 }
 0x1fe   :  { %v1337_v52 = vsel %vm1329_vm3, %v1320_v28, %v1336_v46  ;;  %v1340_v5 = vsel %vm1330_vm4, %v1326_v15, 1326507024  ;;  %v1278_v63 = vsel %vm1193_vm15, %v1277_v14, %v1253_v56  ;;  %v1331_v55 = vsel %vm1327_vm1, %v1311_v11, %v1314_v53 }
 0x1ff   :  { %vm2288_vm5 = vcmp.lt.s32.totalorder %v2287_v36, 0  ;;  %v1341_v9 = vsel %vm1329_vm3, %v1323_v35, %v1340_v5  ;;  %v1465_v39 = vsub.s32 0, %v3455_v42  ;;  %v1338_v3 = vsel %vm1328_vm2, %v1335_v44, %v1337_v52 }
 0x200   :  { %v1262_v0 = vsel %vm2288_vm5, 0, %v2287_v36  ;;  %v1342_v28 = vsel %vm1328_vm2, %v1339_v48, %v1341_v9  ;;  %v1485_v43 = vsub.s32 4, %v1461_v57  ;;  %v1333_v14 = vsel %vm1329_vm3, %v1317_v33, %v1332_v2 }
 0x201   :  { %v1263_v45 = vsub.s32 32, %v1262_v0  ;;  %v1267_v15 = vsub.s32 4294967266, %v1262_v0  ;;  %v1264_v56 = vshll.u32 %v3422_v32, %v1262_v0  ;;  %v2294_v53 = vmin.u32 %v1465_v39, %v3455_v42 }
 0x202   :  { %v3475_v35 = vmul.u32.u64.low %v3419_v16, %v1342_v28  ;;  %v3476_v51 = vmul.u32.u64.high %v3419_v16, %v1342_v28, %v3475_v35  ;;  %v3479_v44 = vmul.u32.u64.low %v3419_v16, %v1338_v3  ;;  %v3480_v46 = vmul.u32.u64.high %v3419_v16, %v1338_v3, %v3479_v44 }
 0x203   :  { %v1265_v11 = vshrl.u32 %v1247_v60, %v1263_v45  ;;  %v1268_v36 = vadd.s32 127, %v1267_v15  ;;  %v1280_v48 = vsel %vm3442_vm0, 0, %v1278_v63  ;;  %vm3487_vm6 = vcmp.le.f32.partialorder %v1399_v31, 0.7853982 }
 0x204   :  { %vm1401_vm7 = vcmp.lt.s32.totalorder %v3257_v22, 0  ;;  %v1467_v33 = vclz %v2294_v53  ;;  %v1334_v52 = vsel %vm1328_vm2, %v1331_v55, %v1333_v14  ;;  %vm1514_vm8 = vcmp.gt.s32.totalorder %v1513_v30, 0 }
 0x205   :  { %v1266_v2 = vor.u32 %v1265_v11, %v1264_v56  ;;  %v1269_v60 = vshll.u32 %v1268_v36, 23  ;;  %vm1352_vm9 = vc.u32 %v3476_v51, %v3479_v44  ;;  %v1510_v63 = vand.u32 8388607, %v4099_v19 }
 0x206   :  { %v2295_v5 = vadd.s32 4294967294, %v1467_v33  ;;  %v1515_v31 = vsel %vm1514_vm8, %v1513_v30, 0  ;;  %v1284_v0 = vadd.s32 3, %v1280_v48  ;;  %v1486_v39 = vsel %vm1401_vm7, %v1485_v43, %v1461_v57 }
 0x207   :  { %v1270_v9 = vor.u32 4788187, %v1269_v60  ;;  %v1353_v3 = vadd.s32 1, %v3480_v46  ;;  %v1455_v27 = vadd.s32 %v3380_v34, %v3387_v7  ;;  %v1350_v55 = vmul.u32 %v3419_v16, %v1334_v52 }
 0x208   :  { %vm2296_vm10 = vcmp.lt.s32.totalorder %v2295_v5, 0  ;;  %v1517_v28 = vand.u32 31, %v1515_v31  ;;  %v1273_v15 = vcvt.s32.f32 %v1266_v2  ;;  %v1488_v35 = vsel %vm3487_vm6, 0, %v1486_v39 }
 0x209   :  { %v1271_v45 = vand.u32 2147483647, %v1270_v9  ;;  %v1470_v14 = vsel %vm2296_vm10, 0, %v2295_v5  ;;  %v1354_v56 = vsel %vm1352_vm9, %v1353_v3, %v3480_v46  ;;  %v3507_v11 = vand.u32 3, %v1284_v0 }
 0x20a   :  { %v1471_v30 = vsub.s32 32, %v1470_v14  ;;  %v1475_v53 = vsub.s32 4294967266, %v1470_v14  ;;  %v1355_v57 = vadd.s32 %v1354_v56, %v1350_v55  ;;  %v1511_v36 = vor.u32 8388608, %v1510_v63 }
 0x20b   :  { %v1274_v43 = vmul.f32 %v1273_v15, %v1271_v45  ;;  %v1518_v34 = vsub.s32 32, %v1517_v28  ;;  %v1472_v7 = vshll.u32 %v3455_v42, %v1470_v14  ;;  %v3510_v60 = vadd.s32 3, %v1488_v35 }
 0x20c   :  { %v1473_v16 = vshrl.u32 %v1455_v27, %v1471_v30  ;;  %v1476_v48 = vadd.s32 127, %v1475_v53  ;;  %v1356_v33 = vadd.s32 536870912, %v1355_v57  ;;  %v3512_v46 = vshrl.u32 %v1515_v31, 5  ;;  %v3530_v53 = vpop.f32.mrb[4].mxu0 }
 0x20d   :  { %v1275_v2 = vxor.u32 2147483648, %v1274_v43  ;;  %v1520_v52 = vshll.u32 %v2740_v1, %v1517_v28  ;;  %v1527_v0 = vshrl.u32 %v4100_v17, %v1518_v34  ;;  %v1521_v42 = vshrl.u32 %v2741_v6, %v1518_v34  ;;  %v2406_v49 = vpop.f32.mrb[5].mxu0 }
 0x20e   :  { %v1474_v5 = vor.u32 %v1473_v16, %v1472_v7  ;;  %v1477_v9 = vshll.u32 %v1476_v48, 23  ;;  %v3515_v39 = vshrl.u32 %v1356_v33, 30  ;;  %v1523_v3 = vshll.u32 %v2741_v6, %v1517_v28 }
 0x20f   :  { %v1276_v63 = vsel %vm1193_vm15, %v1275_v2, %v1274_v43  ;;  %v1524_v27 = vshrl.u32 %v4102_v8, %v1518_v34  ;;  %v1526_v15 = vshll.u32 %v4102_v8, %v1517_v28  ;;  %v1529_v56 = vshll.u32 %v4100_v17, %v1517_v28 }
 0x210   :  { %v1279_v31 = vsel %vm3442_vm0, %v3264_v29, %v1276_v63  ;;  %v1478_v55 = vor.u32 4788187, %v1477_v9  ;;  %v1358_v45 = vshll.u32 %v3515_v39, 30  ;;  %v1481_v14 = vcvt.s32.f32 %v1474_v5  ;;  %v1121_v9 = vpop.f32.mrb[6].mxu0 }
 0x211   :  { %2601 = vcosq.f32 %v1279_v31  ;;  %v1530_v30 = vshrl.u32 %v2744_v23, %v1518_v34  ;;  %v1528_v7 = vor.u32 %v1527_v0, %v1526_v15  ;;  %v1522_v16 = vor.u32 %v1521_v42, %v1520_v52  ;;  %v2407_v8 = vpop.f32.mrb[7].mxu0 }
 0x212   :  { %2603 = vsinq.f32 %v1279_v31  ;;  %v1479_v35 = vand.u32 2147483647, %v1478_v55  ;;  %v3532_v43 = vsub.s32 %v1355_v57, %v1358_v45  ;;  %v1525_v48 = vor.u32 %v1524_v27, %v1523_v3 }
 0x213   :  { %v1531_v33 = vor.u32 %v1530_v30, %v1529_v56  ;;  %v1533_v2 = vshrl.u32 %v2745_v47, %v1518_v34  ;;  %v1532_v19 = vshll.u32 %v2744_v23, %v1517_v28  ;;  %v3537_v17 = vshll.u32 %v1511_v36, 8 }
 0x214   :  { %v1482_v63 = vmul.f32 %v1481_v14, %v1479_v35  ;;  %v1361_v5 = vsub.s32 0, %v3532_v43  ;;  %vm1290_vm11 = vcmp.eq.s32.totalorder %v3507_v11, 2  ;;  %v1351_v57 = vadd.s32 %v3479_v44, %v3476_v51 }
 0x215   :  { %vm1535_vm12 = vcmp.lt.s32.totalorder %v3512_v46, 1  ;;  %vm1538_vm13 = vcmp.lt.s32.totalorder %v3512_v46, 4  ;;  %v3546_v52 = vadd.f32 %v3401_v58, %v3357_v59  ;;  %vm1287_vm14 = vcmp.eq.s32.totalorder %v3507_v11, 0 }
 0x216   :  { %v1483_v0 = vxor.u32 2147483648, %v1482_v63  ;;  %v2290_v28 = vmin.u32 %v1361_v5, %v3532_v43  ;;  %v1534_v36 = vor.u32 %v1533_v2, %v1532_v19  ;;  %v1540_v8 = vsel %vm1538_vm13, %v1528_v7, 2102212464 }
 0x217   :  { %vm1286_vm15 = vcmp.lt.s32.totalorder %v3507_v11, 2  ;;  %vm3556_vm0 = vcmp.eq.s32.totalorder %v2136_v37, 1  ;;  %v1519_v58 = vshrl.u32 %v2740_v1, %v1518_v34  ;;  %vm1537_vm1 = vcmp.lt.s32.totalorder %v3512_v46, 3 }
 0x218   :  { %v1543_v44 = vsel %vm1535_vm12, %v1522_v16, %v1525_v48  ;;  %v1544_v19 = vsel %vm1538_vm13, %v1531_v33, 920167782  ;;  %vm1283_vm2 = vweird.f32 %v3264_v29  ;;  %v1484_v42 = vsel %vm1401_vm7, %v1483_v0, %v1482_v63 }
 0x219   :  { %vm1297_vm3 = vcmp.lt.s32.totalorder %v3269_v40, 0  ;;  %v1363_v37 = vclz %v2290_v28  ;;  %vm1536_vm4 = vcmp.lt.s32.totalorder %v3512_v46, 2  ;;  %v1545_v34 = vsel %vm1537_vm1, %v1528_v7, %v1544_v19 }
 0x21a   :  { %v1487_v3 = vsel %vm3487_vm6, %v3257_v22, %v1484_v42  ;;  %v1539_v27 = vsel %vm1535_vm12, %v1519_v58, %v1522_v16  ;;  %v1541_v31 = vsel %vm1537_vm1, %v1525_v48, %v1540_v8  ;;  %v1547_v55 = vsel %vm1535_vm12, %v1525_v48, %v1528_v7 }
 0x21b   :  { %2605 = vcosq.f32 %v1487_v3  ;;  %v2291_v45 = vadd.s32 4294967294, %v1363_v37  ;;  %v1546_v15 = vsel %vm1536_vm4, %v1543_v44, %v1545_v34  ;;  %v1548_v14 = vsel %vm1538_vm13, %v1534_v36, 1326507024  ;;  %v2602_v56 = vpop.eup %2601 }
 0x21c   :  { %2607 = vsinq.f32 %v1487_v3  ;;  %v1549_v32 = vsel %vm1537_vm1, %v1531_v33, %v1548_v14  ;;  %v3589_v30 = vmul.u32.u64.low %v3537_v17, %v1546_v15  ;;  %v3590_v35 = vmul.u32.u64.high %v3537_v17, %v1546_v15, %v3589_v30  ;;  %v2604_v49 = vpop.eup %2603 }
 0x21d   :  { %v1291_v7 = vxor.u32 2147483648, %v2602_v56  ;;  %vm2292_vm5 = vcmp.lt.s32.totalorder %v2291_v45, 0  ;;  %v1381_v16 = vsub.s32 4, %v3515_v39  ;;  %v1550_v48 = vsel %vm1536_vm4, %v1547_v55, %v1549_v32 }
 0x21e   :  { %v1288_v2 = vxor.u32 2147483648, %v2604_v49  ;;  %v1366_v9 = vsel %vm2292_vm5, 0, %v2291_v45  ;;  %v3597_v63 = vmul.u32.u64.low %v3537_v17, %v1550_v48  ;;  %v3598_v5 = vmul.u32.u64.high %v3537_v17, %v1550_v48, %v3597_v63 }
 0x21f   :  { %v1292_v33 = vsel %vm1290_vm11, %v1291_v7, %v2604_v49  ;;  %v1367_v0 = vsub.s32 32, %v1366_v9  ;;  %v1371_v28 = vsub.s32 4294967266, %v1366_v9  ;;  %v1542_v36 = vsel %vm1536_vm4, %v1539_v27, %v1541_v31 }
 0x220   :  { %v1289_v8 = vsel %vm1287_vm14, %v2602_v56, %v1288_v2  ;;  %v1493_v58 = vand.u32 3, %v3510_v60  ;;  %v1368_v44 = vshll.u32 %v3532_v43, %v1366_v9  ;;  %v1561_v19 = vadd.s32 1, %v3590_v35 }
 0x221   :  { %v1293_v42 = vsel %vm1286_vm15, %v1289_v8, %v1292_v33  ;;  %v1369_v37 = vshrl.u32 %v1351_v57, %v1367_v0  ;;  %v1372_v34 = vadd.s32 127, %v1371_v28  ;;  %v1610_v3 = vand.u32 2139095040, %v3546_v52 }
 0x222   :  { %v1294_v46 = vsel %vm1283_vm2, nan, %v1293_v42  ;;  %v1382_v27 = vsel %vm1297_vm3, %v1381_v16, %v3515_v39  ;;  %v1558_v60 = vmul.u32 %v3537_v17, %v1542_v36  ;;  %vm1560_vm6 = vc.u32 %v3598_v5, %v3589_v30 }
 0x223   :  { %v2178_v11 = vsel %vm3556_vm0, %v3254_v20, %v1294_v46  ;;  %v1370_v43 = vor.u32 %v1369_v37, %v1368_v44  ;;  %v1373_v57 = vshll.u32 %v1372_v34, 23  ;;  %v1562_v31 = vsel %vm1560_vm6, %v1561_v19, %v3590_v35 }
 0x224   :  { %2187 = vst [vmem:[#allocation8] sm:$0xff] %v2178_v11  ;;  %vm2171_vm7 = vcmp.eq.s32.totalorder %v3415_v61, 1  ;;  %vm3627_vm8 = vcmp.le.f32.partialorder %v1295_v62, 0.7853982  ;;  %v1563_v17 = vadd.s32 %v1562_v31, %v1558_v60  ;;  %v1611_v39 = vshrl.u32 %v1610_v3, 23 }
 0x225   :  { %v2606_v55 = vpop.eup %2605  ;;  %vm1491_vm9 = vweird.f32 %v3257_v22  ;;  %v1374_v51 = vor.u32 4788187, %v1373_v57  ;;  %v1384_v20 = vsel %vm3627_vm8, 0, %v1382_v27  ;;  %v1159_v45 = vsub.s32 5, %v3235_v10 }
 0x226   :  { %v2608_v15 = vpop.eup %2607  ;;  %v1499_v14 = vxor.u32 2147483648, %v2606_v55  ;;  %v1564_v56 = vadd.s32 536870912, %v1563_v17  ;;  %v1607_v32 = vand.u32 2147483647, %v3546_v52  ;;  %v2301_v62 = vadd.s32 4294967169, %v1611_v39 }
 0x227   :  { %v1496_v35 = vxor.u32 2147483648, %v2608_v15  ;;  %vm1498_vm10 = vcmp.eq.s32.totalorder %v1493_v58, 2  ;;  %v1375_v49 = vand.u32 2147483647, %v1374_v51  ;;  %v1377_v7 = vcvt.s32.f32 %v1370_v43 }
 0x228   :  { %vm1495_vm11 = vcmp.eq.s32.totalorder %v1493_v58, 0  ;;  %v1500_v16 = vsel %vm1498_vm10, %v1499_v14, %v2608_v15  ;;  %v1565_v48 = vshrl.u32 %v1564_v56, 30  ;;  %v1617_v2 = vadd.s32 1, %v2301_v62 }
 0x229   :  { %vm1494_vm12 = vcmp.lt.s32.totalorder %v1493_v58, 2  ;;  %v1497_v9 = vsel %vm1495_vm11, %v2606_v55, %v1496_v35  ;;  %v1378_v63 = vmul.f32 %v1377_v7, %v1375_v49  ;;  %v1388_v33 = vadd.s32 3, %v1384_v20 }
 0x22a   :  { %v1501_v0 = vsel %vm1494_vm12, %v1497_v9, %v1500_v16  ;;  %v1566_v28 = vshll.u32 %v1565_v48, 30  ;;  %v1614_v36 = vand.u32 8388607, %v1607_v32  ;;  %vm1618_vm13 = vcmp.gt.s32.totalorder %v1617_v2, 0 }
 0x22b   :  { %v1502_v8 = vsel %vm1491_vm9, nan, %v1501_v0  ;;  %v1379_v44 = vxor.u32 2147483648, %v1378_v63  ;;  %v1619_v19 = vsel %vm1618_vm13, %v1617_v2, 0  ;;  %v3642_v42 = vadd.f32 %v3407_v21, %v3365_v50 }
 0x22c   :  { %v2180_v58 = vsel %vm2171_vm7, %v3249_v18, %v1502_v8  ;;  %v4147_v37 = vsub.s32 1, %v3235_v10  ;;  %vm1505_vm14 = vcmp.lt.s32.totalorder %v3290_v38, 0  ;;  %v3653_v3 = vsub.s32 %v1563_v17, %v1566_v28 }
 0x22d   :  { %2189 = vst [vmem:[#allocation8 + $0x10] sm:$0xff] %v2180_v58  ;;  %v1380_v22 = vsel %vm1297_vm3, %v1379_v44, %v1378_v63  ;;  %v3657_v46 = vand.u32 3, %v1388_v33  ;;  %v1559_v21 = vadd.s32 %v3589_v30, %v3598_v5  ;;  %v1621_v61 = vand.u32 31, %v1619_v19 }
 0x22e   :  { %v3650_v34 = vrot.slane %v3391_v54, %v4147_v37  ;;  %v1383_v18 = vsel %vm3627_vm8, %v3269_v40, %v1380_v22  ;;  %v1569_v27 = vsub.s32 0, %v3653_v3  ;;  %v1589_v60 = vsub.s32 4, %v1565_v48 }
 0x22f   :  { %v1615_v11 = vor.u32 8388608, %v1614_v36  ;;  %2609 = vcosq.f32 %v1383_v18  ;;  %v3665_v43 = vshrl.u32 %v1619_v19, 5  ;;  %v1622_v57 = vsub.s32 32, %v1621_v61 }
 0x230   :  { %v1818_v31 = vand.u32 2139095040, %v3642_v42  ;;  %2611 = vsinq.f32 %v1383_v18  ;;  %v2298_v17 = vmin.u32 %v1569_v27, %v3653_v3  ;;  %v1624_v30 = vshll.u32 %v2740_v1, %v1621_v61 }
 0x231   :  { %v1627_v5 = vshll.u32 %v2741_v6, %v1621_v61  ;;  %v1625_v29 = vshrl.u32 %v2741_v6, %v1622_v57  ;;  %v4148_v39 = vmov 2131351028   ;;  %v4149_v20 = vmov 2102212464  }
 0x232   :  { %v1628_v55 = vshrl.u32 %v4148_v39, %v1622_v57  ;;  %v1630_v51 = vshll.u32 %v4148_v39, %v1621_v61  ;;  %v1631_v15 = vshrl.u32 %v4149_v20, %v1622_v57  ;;  %v1571_v14 = vclz %v2298_v17 }
 0x233   :  { %v3677_v56 = vsel %vm1505_vm14, %v1589_v60, %v1565_v48  ;;  %v3679_v62 = vshll.u32 %v1615_v11, 8  ;;  %v1815_v35 = vand.u32 2147483647, %v3642_v42  ;;  %vm1394_vm15 = vcmp.eq.s32.totalorder %v3657_v46, 2 }
 0x234   :  { %v1626_v49 = vor.u32 %v1625_v29, %v1624_v30  ;;  %v1629_v7 = vor.u32 %v1628_v55, %v1627_v5  ;;  %v1632_v16 = vor.u32 %v1631_v15, %v1630_v51  ;;  %v1633_v2 = vshll.u32 %v4149_v20, %v1621_v61 }
 0x235   :  { %vm1391_vm0 = vcmp.eq.s32.totalorder %v3657_v46, 0  ;;  %v4150_v9 = vand.u32 2147483647, %v3290_v38  ;;  %v2299_v48 = vadd.s32 4294967294, %v1571_v14  ;;  %v1634_v33 = vshrl.u32 %v2744_v23, %v1622_v57 }
 0x236   :  { %v1636_v0 = vshll.u32 %v2744_v23, %v1621_v61  ;;  %v1637_v28 = vshrl.u32 %v2745_v47, %v1622_v57  ;;  %vm1390_vm2 = vcmp.lt.s32.totalorder %v3657_v46, 2  ;;  %vm2170_vm3 = vcmp.eq.s32.totalorder %v3650_v34, 1 }
 0x237   :  { %vm3687_vm1 = vcmp.le.f32.partialorder %v4150_v9, 0.7853982  ;;  %v1623_v36 = vshrl.u32 %v2740_v1, %v1622_v57  ;;  %vm1639_vm4 = vcmp.lt.s32.totalorder %v3665_v43, 1  ;;  %vm1640_vm5 = vcmp.lt.s32.totalorder %v3665_v43, 2 }
 0x238   :  { %v1819_v8 = vshrl.u32 %v1818_v31, 23  ;;  %vm1387_vm6 = vweird.f32 %v3269_v40  ;;  %vm2300_vm7 = vcmp.lt.s32.totalorder %v2299_v48, 0  ;;  %v1635_v44 = vor.u32 %v1634_v33, %v1633_v2 }
 0x239   :  { %v1638_v19 = vor.u32 %v1637_v28, %v1636_v0  ;;  %vm1642_vm8 = vcmp.lt.s32.totalorder %v3665_v43, 4  ;;  %v1574_v58 = vsel %vm2300_vm7, 0, %v2299_v48  ;;  %vm1641_vm9 = vcmp.lt.s32.totalorder %v3665_v43, 3  ;;  %v2610_v11 = vpop.eup %2609 }
 0x23a   :  { %v1643_v37 = vsel %vm1639_vm4, %v1623_v36, %v1626_v49  ;;  %v1644_v22 = vsel %vm1642_vm8, %v1632_v16, 2102212464  ;;  %v1575_v61 = vsub.s32 32, %v1574_v58  ;;  %v1579_v18 = vsub.s32 4294967266, %v1574_v58  ;;  %v2612_v5 = vpop.eup %2611 }
 0x23b   :  { %v1647_v27 = vsel %vm1639_vm4, %v1626_v49, %v1629_v7  ;;  %v1651_v60 = vsel %vm1639_vm4, %v1629_v7, %v1632_v16  ;;  %v1576_v57 = vshll.u32 %v3653_v3, %v1574_v58  ;;  %v1648_v31 = vsel %vm1642_vm8, %v1635_v44, 920167782 }
 0x23c   :  { %v1652_v17 = vsel %vm1642_vm8, %v1638_v19, 1326507024  ;;  %v2309_v30 = vadd.s32 4294967169, %v1819_v8  ;;  %v1395_v29 = vxor.u32 2147483648, %v2610_v11  ;;  %v1577_v55 = vshrl.u32 %v1559_v21, %v1575_v61 }
 0x23d   :  { %v1580_v51 = vadd.s32 127, %v1579_v18  ;;  %v1649_v15 = vsel %vm1641_vm9, %v1632_v16, %v1648_v31  ;;  %v1392_v14 = vxor.u32 2147483648, %v2612_v5  ;;  %v1645_v2 = vsel %vm1641_vm9, %v1629_v7, %v1644_v22 }
 0x23e   :  { %v1650_v49 = vsel %vm1640_vm5, %v1647_v27, %v1649_v15  ;;  %v1653_v3 = vsel %vm1641_vm9, %v1635_v44, %v1652_v17  ;;  %v1396_v9 = vsel %vm1394_vm15, %v1395_v29, %v2612_v5  ;;  %v1578_v48 = vor.u32 %v1577_v55, %v1576_v57 }
 0x23f   :  { %v1581_v33 = vshll.u32 %v1580_v51, 23  ;;  %v1654_v21 = vsel %vm1640_vm5, %v1651_v60, %v1653_v3  ;;  %v1393_v16 = vsel %vm1391_vm0, %v2610_v11, %v1392_v14  ;;  %v1592_v7 = vsel %vm3687_vm1, 0, %v3677_v56 }
 0x240   :  { %v3721_v0 = vmul.u32.u64.low %v3679_v62, %v1654_v21  ;;  %v3722_v28 = vmul.u32.u64.high %v3679_v62, %v1654_v21, %v3721_v0  ;;  %v1397_v36 = vsel %vm1390_vm2, %v1393_v16, %v1396_v9  ;;  %v1646_v44 = vsel %vm1640_vm5, %v1643_v37, %v1645_v2 }
 0x241   :  { %v1582_v8 = vor.u32 4788187, %v1581_v33  ;;  %v1825_v19 = vadd.s32 1, %v2309_v30  ;;  %v1398_v58 = vsel %vm1387_vm6, nan, %v1397_v36  ;;  %v1822_v56 = vand.u32 8388607, %v1815_v35 }
 0x242   :  { %v3731_v22 = vmul.u32.u64.low %v3679_v62, %v1650_v49  ;;  %v3732_v61 = vmul.u32.u64.high %v3679_v62, %v1650_v49, %v3731_v22  ;;  %v2179_v46 = vsel %vm2170_vm3, %v3261_v25, %v1398_v58  ;;  %v1585_v27 = vcvt.s32.f32 %v1578_v48 }
 0x243   :  { %v1583_v18 = vand.u32 2147483647, %v1582_v8  ;;  %vm1826_vm10 = vcmp.gt.s32.totalorder %v1825_v19, 0  ;;  %2188 = vst [vmem:[#allocation8 + $0x8] sm:$0xff] %v2179_v46  ;;  %v1160_v40 = vrot.slane %v3238_v12, %v1159_v45  ;;  %v4153_v60 = vsub.s32 3, %v3235_v10 }
 0x244   :  { %v1827_v43 = vsel %vm1826_vm10, %v1825_v19, 0  ;;  %vm1664_vm11 = vc.u32 %v3722_v28, %v3731_v22  ;;  %v1596_v25 = vadd.s32 3, %v1592_v7  ;;  %v1662_v57 = vmul.u32 %v3679_v62, %v1646_v44 }
 0x245   :  { %v1586_v37 = vmul.f32 %v1585_v27, %v1583_v18  ;;  %v3746_v11 = vrot.slane %v3391_v54, %v4153_v60  ;;  %v1829_v34 = vand.u32 31, %v1827_v43  ;;  %v1665_v31 = vadd.s32 1, %v3732_v61 }
 0x246   :  { %v1823_v17 = vor.u32 8388608, %v1822_v56  ;;  %v1828_v5 = vshrl.u32 %v1827_v43, 5  ;;  %v1597_v19 = vand.u32 3, %v1596_v25  ;;  %vm1595_vm6 = vweird.f32 %v3290_v38 }
 0x247   :  { %v1587_v30 = vxor.u32 2147483648, %v1586_v37  ;;  %v1830_v29 = vsub.s32 32, %v1829_v34  ;;  %v1832_v12 = vshll.u32 %v2740_v1, %v1829_v34  ;;  %v1666_v55 = vsel %vm1664_vm11, %v1665_v31, %v3732_v61 }
 0x248   :  { %v1835_v51 = vshll.u32 %v2741_v6, %v1829_v34  ;;  %v1838_v15 = vshll.u32 %v4148_v39, %v1829_v34  ;;  %v1841_v14 = vshll.u32 %v4149_v20, %v1829_v34  ;;  %v1667_v62 = vadd.s32 %v1666_v55, %v1662_v57 }
 0x249   :  { %v1588_v2 = vsel %vm1505_vm14, %v1587_v30, %v1586_v37  ;;  %v1833_v49 = vshrl.u32 %v2741_v6, %v1830_v29  ;;  %v1844_v3 = vshll.u32 %v2744_v23, %v1829_v34  ;;  %v1836_v48 = vshrl.u32 %v4148_v39, %v1830_v29 }
 0x24a   :  { %v1591_v9 = vsel %vm3687_vm1, %v3290_v38, %v1588_v2  ;;  %v1839_v33 = vshrl.u32 %v4149_v20, %v1830_v29  ;;  %v1842_v21 = vshrl.u32 %v2744_v23, %v1830_v29  ;;  %v1668_v16 = vadd.s32 536870912, %v1667_v62 }
 0x24b   :  { %2613 = vcosq.f32 %v1591_v9  ;;  %v1834_v7 = vor.u32 %v1833_v49, %v1832_v12  ;;  %v1845_v0 = vshrl.u32 %v2745_v47, %v1830_v29  ;;  %v1837_v36 = vor.u32 %v1836_v48, %v1835_v51 }
 0x24c   :  { %2615 = vsinq.f32 %v1591_v9  ;;  %v1840_v8 = vor.u32 %v1839_v33, %v1838_v15  ;;  %v1843_v44 = vor.u32 %v1842_v21, %v1841_v14  ;;  %v1669_v58 = vshrl.u32 %v1668_v16, 30 }
 0x24d   :  { %v1846_v61 = vor.u32 %v1845_v0, %v1844_v3  ;;  %vm1847_vm12 = vcmp.lt.s32.totalorder %v1828_v5, 1  ;;  %v1831_v63 = vshrl.u32 %v2740_v1, %v1830_v29  ;;  %vm1850_vm13 = vcmp.lt.s32.totalorder %v1828_v5, 4 }
 0x24e   :  { %v1855_v56 = vsel %vm1847_vm12, %v1834_v7, %v1837_v36  ;;  %v1863_v46 = vshll.u32 %v1823_v17, 8  ;;  %v1670_v18 = vshll.u32 %v1669_v58, 30  ;;  %vm1849_vm14 = vcmp.lt.s32.totalorder %v1828_v5, 3 }
 0x24f   :  { %v1852_v27 = vsel %vm1850_vm13, %v1840_v8, 2102212464  ;;  %v1856_v43 = vsel %vm1850_vm13, %v1843_v44, 920167782  ;;  %vm1848_vm15 = vcmp.lt.s32.totalorder %v1828_v5, 2  ;;  %v1859_v60 = vsel %vm1847_vm12, %v1837_v36, %v1840_v8 }
 0x250   :  { %v1857_v37 = vsel %vm1849_vm14, %v1840_v8, %v1856_v43  ;;  %v1860_v34 = vsel %vm1850_vm13, %v1846_v61, 1326507024  ;;  %v3769_v57 = vsub.s32 %v1667_v62, %v1670_v18  ;;  %v1851_v31 = vsel %vm1847_vm12, %v1831_v63, %v1834_v7 }
 0x251   :  { %v1858_v25 = vsel %vm1848_vm15, %v1855_v56, %v1857_v37  ;;  %v3773_v30 = vadd.f32 %v1160_v40, %v3367_v4  ;;  %v1853_v29 = vsel %vm1849_vm14, %v1837_v36, %v1852_v27  ;;  %v1861_v12 = vsel %vm1849_vm14, %v1843_v44, %v1860_v34 }
 0x252   :  { %v3775_v55 = vmul.u32.u64.low %v1863_v46, %v1858_v25  ;;  %v3776_v17 = vmul.u32.u64.high %v1863_v46, %v1858_v25, %v3775_v55  ;;  %v1673_v51 = vsub.s32 0, %v3769_v57  ;;  %v1693_v15 = vsub.s32 4, %v1669_v58 }
 0x253   :  { %v1862_v14 = vsel %vm1848_vm15, %v1859_v60, %v1861_v12  ;;  %vm2172_vm0 = vcmp.eq.s32.totalorder %v3746_v11, 1  ;;  %vm1609_vm1 = vcmp.lt.s32.totalorder %v3546_v52, 0  ;;  %v1854_v3 = vsel %vm1848_vm15, %v1851_v31, %v1853_v29 }
 0x254   :  { %v3782_v2 = vmul.u32.u64.low %v1863_v46, %v1862_v14  ;;  %v3783_v62 = vmul.u32.u64.high %v1863_v46, %v1862_v14, %v3782_v2  ;;  %v2302_v40 = vmin.u32 %v1673_v51, %v3769_v57  ;;  %v1714_v9 = vand.u32 2139095040, %v3773_v30 }
 0x255   :  { %v2614_v49 = vpop.eup %2613  ;;  %vm1598_vm2 = vcmp.lt.s32.totalorder %v1597_v19, 2  ;;  %vm1599_vm3 = vcmp.eq.s32.totalorder %v1597_v19, 0  ;;  %v1873_v21 = vadd.s32 1, %v3776_v17  ;;  %vm1602_vm4 = vcmp.eq.s32.totalorder %v1597_v19, 2 }
 0x256   :  { %v2616_v48 = vpop.eup %2615  ;;  %v1603_v33 = vxor.u32 2147483648, %v2614_v49  ;;  %v1675_v7 = vclz %v2302_v40  ;;  %v1694_v0 = vsel %vm1609_vm1, %v1693_v15, %v1669_v58  ;;  %v1870_v8 = vmul.u32 %v1863_v46, %v1854_v3 }
 0x257   :  { %v1600_v16 = vxor.u32 2147483648, %v2616_v48  ;;  %vm1872_vm5 = vc.u32 %v3783_v62, %v3775_v55  ;;  %v1711_v5 = vand.u32 2147483647, %v3773_v30  ;;  %v1715_v56 = vshrl.u32 %v1714_v9, 23  ;;  %v2637_v9 = vld [vmem:[#allocation7] sm:$0xff] }
 0x258   :  { %v1604_v36 = vsel %vm1602_vm4, %v1603_v33, %v2616_v48  ;;  %v2303_v61 = vadd.s32 4294967294, %v1675_v7  ;;  %v1874_v63 = vsel %vm1872_vm5, %v1873_v21, %v3776_v17  ;;  %vm3800_vm7 = vcmp.le.f32.partialorder %v1607_v32, 0.7853982 }
 0x259   :  { %v1601_v44 = vsel %vm1599_vm3, %v2614_v49, %v1600_v16  ;;  %v1875_v46 = vadd.s32 %v1874_v63, %v1870_v8  ;;  %v1663_v43 = vadd.s32 %v3731_v22, %v3722_v28  ;;  %v2305_v37 = vadd.s32 4294967169, %v1715_v56 }
 0x25a   :  { %v1605_v18 = vsel %vm1598_vm2, %v1601_v44, %v1604_v36  ;;  %vm2304_vm8 = vcmp.lt.s32.totalorder %v2303_v61, 0  ;;  %v1696_v19 = vsel %vm3800_vm7, 0, %v1694_v0  ;;  %v1718_v25 = vand.u32 8388607, %v1711_v5 }
 0x25b   :  { %v1606_v27 = vsel %vm1595_vm6, nan, %v1605_v18  ;;  %v1678_v38 = vsel %vm2304_vm8, 0, %v2303_v61  ;;  %v1876_v34 = vadd.s32 536870912, %v1875_v46  ;;  %v1721_v29 = vadd.s32 1, %v2305_v37 }
 0x25c   :  { %v2181_v60 = vsel %vm2172_vm0, %v3259_v24, %v1606_v27  ;;  %v1679_v32 = vsub.s32 32, %v1678_v38  ;;  %v1683_v31 = vsub.s32 4294967266, %v1678_v38  ;;  %v1167_v28 = vsub.s32 7, %v3235_v10 }
 0x25d   :  { %2190 = vst [vmem:[#allocation8 + $0x18] sm:$0xff] %v2181_v60  ;;  %v1877_v12 = vshrl.u32 %v1876_v34, 30  ;;  %v1680_v22 = vshll.u32 %v3769_v57, %v1678_v38  ;;  %vm1722_vm9 = vcmp.gt.s32.totalorder %v1721_v29, 0  ;;  %v1700_v24 = vadd.s32 3, %v1696_v19 }
 0x25e   :  { %v1681_v17 = vshrl.u32 %v1663_v43, %v1679_v32  ;;  %v1684_v11 = vadd.s32 127, %v1683_v31  ;;  %v1723_v15 = vsel %vm1722_vm9, %v1721_v29, 0  ;;  %v1719_v49 = vor.u32 8388608, %v1718_v25 }
 0x25f   :  { %v1878_v51 = vshll.u32 %v1877_v12, 30  ;;  %v1725_v40 = vand.u32 31, %v1723_v15  ;;  %v1168_v48 = vrot.slane %v2637_v9, %v1167_v28  ;;  %v4156_v21 = vsub.s32 4, %v3235_v10 }
 0x260   :  { %v1682_v14 = vor.u32 %v1681_v17, %v1680_v22  ;;  %v1685_v2 = vshll.u32 %v1684_v11, 23  ;;  %v1901_v16 = vsub.s32 4, %v1877_v12  ;;  %v3824_v0 = vand.u32 3, %v1700_v24 }
 0x261   :  { %v3815_v3 = vsub.s32 %v1875_v46, %v1878_v51  ;;  %v3822_v57 = vrot.slane %v3391_v54, %v4156_v21  ;;  %v1726_v7 = vsub.s32 32, %v1725_v40  ;;  %vm1817_vm10 = vcmp.lt.s32.totalorder %v3642_v42, 0 }
 0x262   :  { %v1686_v33 = vor.u32 4788187, %v1685_v2  ;;  %v1871_v36 = vadd.s32 %v3775_v55, %v3783_v62  ;;  %v1689_v61 = vcvt.s32.f32 %v1682_v14  ;;  %v3831_v56 = vshll.u32 %v1719_v49, 8 }
 0x263   :  { %v1881_v8 = vsub.s32 0, %v3815_v3  ;;  %v1729_v63 = vshrl.u32 %v2741_v6, %v1726_v7  ;;  %v1724_v46 = vshrl.u32 %v1723_v15, 5  ;;  %v1732_v27 = vshrl.u32 %v4148_v39, %v1726_v7 }
 0x264   :  { %v1687_v44 = vand.u32 2147483647, %v1686_v33  ;;  %v3836_v43 = vadd.f32 %v1168_v48, %v3375_v26  ;;  %v3840_v55 = vsel %vm1817_vm10, %v1901_v16, %v1877_v12  ;;  %v1728_v62 = vshll.u32 %v2740_v1, %v1725_v40 }
 0x265   :  { %v2310_v18 = vmin.u32 %v1881_v8, %v3815_v3  ;;  %v1735_v60 = vshrl.u32 %v4149_v20, %v1726_v7  ;;  %v1727_v19 = vshrl.u32 %v2740_v1, %v1726_v7  ;;  %v1731_v34 = vshll.u32 %v2741_v6, %v1725_v40 }
 0x266   :  { %v1690_v37 = vmul.f32 %v1689_v61, %v1687_v44  ;;  %v1734_v32 = vshll.u32 %v4148_v39, %v1725_v40  ;;  %v1730_v25 = vor.u32 %v1729_v63, %v1728_v62  ;;  %v1737_v29 = vshll.u32 %v4149_v20, %v1725_v40 }
 0x267   :  { %v1883_v38 = vclz %v2310_v18  ;;  %v1738_v22 = vshrl.u32 %v2744_v23, %v1726_v7  ;;  %v1733_v12 = vor.u32 %v1732_v27, %v1731_v34  ;;  %v1740_v11 = vshll.u32 %v2744_v23, %v1725_v40 }
 0x268   :  { %v1691_v31 = vxor.u32 2147483648, %v1690_v37  ;;  %v1741_v24 = vshrl.u32 %v2745_v47, %v1726_v7  ;;  %v1736_v15 = vor.u32 %v1735_v60, %v1734_v32  ;;  %vm1743_vm11 = vcmp.lt.s32.totalorder %v1724_v46, 1 }
 0x269   :  { %v2311_v17 = vadd.s32 4294967294, %v1883_v38  ;;  %v1739_v14 = vor.u32 %v1738_v22, %v1737_v29  ;;  %vm1744_vm13 = vcmp.lt.s32.totalorder %v1724_v46, 2  ;;  %vm1745_vm14 = vcmp.lt.s32.totalorder %v1724_v46, 3 }
 0x26a   :  { %v1692_v51 = vsel %vm1609_vm1, %v1691_v31, %v1690_v37  ;;  %v1742_v49 = vor.u32 %v1741_v24, %v1740_v11  ;;  %vm1746_vm15 = vcmp.lt.s32.totalorder %v1724_v46, 4  ;;  %v1751_v33 = vsel %vm1743_vm11, %v1730_v25, %v1733_v12  ;;  %v2284_v31 = vld [vmem:[#allocation7 + $0x8] ss:$0 sm:$0xff] }
 0x26b   :  { %v1695_v2 = vsel %vm3800_vm7, %v3546_v52, %v1692_v51  ;;  %vm2312_vm12 = vcmp.lt.s32.totalorder %v2311_v17, 0  ;;  %v1748_v21 = vsel %vm1746_vm15, %v1736_v15, 2102212464  ;;  %v1752_v16 = vsel %vm1746_vm15, %v1739_v14, 920167782 }
 0x26c   :  { %2617 = vcosq.f32 %v1695_v2  ;;  %v1886_v9 = vsel %vm2312_vm12, 0, %v2311_v17  ;;  %v1755_v7 = vsel %vm1743_vm11, %v1733_v12, %v1736_v15  ;;  %v1756_v8 = vsel %vm1746_vm15, %v1742_v49, 1326507024 }
 0x26d   :  { %2619 = vsinq.f32 %v1695_v2  ;;  %v1887_v40 = vsub.s32 32, %v1886_v9  ;;  %v1891_v48 = vsub.s32 4294967266, %v1886_v9  ;;  %v1888_v58 = vshll.u32 %v3815_v3, %v1886_v9 }
 0x26e   :  { %v1753_v63 = vsel %vm1745_vm14, %v1736_v15, %v1752_v16  ;;  %v1747_v18 = vsel %vm1743_vm11, %v1727_v19, %v1730_v25  ;;  %v1757_v37 = vsel %vm1745_vm14, %v1739_v14, %v1756_v8  ;;  %v1922_v62 = vand.u32 2139095040, %v3836_v43 }
 0x26f   :  { %v1889_v44 = vshrl.u32 %v1871_v36, %v1887_v40  ;;  %v1892_v61 = vadd.s32 127, %v1891_v48  ;;  %v1754_v27 = vsel %vm1744_vm13, %v1751_v33, %v1753_v63  ;;  %v1749_v34 = vsel %vm1745_vm14, %v1733_v12, %v1748_v21 }
 0x270   :  { %v1758_v32 = vsel %vm1744_vm13, %v1755_v7, %v1757_v37  ;;  %v3871_v29 = vmul.u32.u64.low %v3831_v56, %v1754_v27  ;;  %v3872_v19 = vmul.u32.u64.high %v3831_v56, %v1754_v27, %v3871_v29  ;;  %vm1699_vm0 = vweird.f32 %v3546_v52 }
 0x271   :  { %v1890_v60 = vor.u32 %v1889_v44, %v1888_v58  ;;  %v1893_v38 = vshll.u32 %v1892_v61, 23  ;;  %v3867_v3 = vmul.u32.u64.low %v3831_v56, %v1758_v32  ;;  %v3868_v36 = vmul.u32.u64.high %v3831_v56, %v1758_v32, %v3867_v3 }
 0x272   :  { %vm2173_vm1 = vcmp.eq.s32.totalorder %v3822_v57, 1  ;;  %v1923_v22 = vshrl.u32 %v1922_v62, 23  ;;  %vm1703_vm2 = vcmp.eq.s32.totalorder %v3824_v0, 0  ;;  %vm3880_vm3 = vcmp.le.f32.partialorder %v1815_v35, 0.7853982 }
 0x273   :  { %v1894_v25 = vor.u32 4788187, %v1893_v38  ;;  %v1750_v12 = vsel %vm1744_vm13, %v1747_v18, %v1749_v34  ;;  %v3886_v11 = vadd.f32 %v2284_v31, %v3530_v53  ;;  %v1897_v51 = vcvt.s32.f32 %v1890_v60 }
 0x274   :  { %v1904_v15 = vsel %vm3880_vm3, 0, %v3840_v55  ;;  %v2313_v14 = vadd.s32 4294967169, %v1923_v22  ;;  %vm1706_vm4 = vcmp.eq.s32.totalorder %v3824_v0, 2  ;;  %vm1768_vm5 = vc.u32 %v3868_v36, %v3871_v29 }
 0x275   :  { %v1895_v24 = vand.u32 2147483647, %v1894_v25  ;;  %v1769_v35 = vadd.s32 1, %v3872_v19  ;;  %v1919_v46 = vand.u32 2147483647, %v3836_v43  ;;  %v1766_v48 = vmul.u32 %v3831_v56, %v1750_v12 }
 0x276   :  { %v2618_v2 = vpop.eup %2617  ;;  %v1929_v33 = vadd.s32 1, %v2313_v14  ;;  %v1908_v16 = vadd.s32 3, %v1904_v15  ;;  %v2026_v7 = vand.u32 2139095040, %v3886_v11  ;;  %vm1702_vm7 = vcmp.lt.s32.totalorder %v3824_v0, 2 }
 0x277   :  { %v2620_v49 = vpop.eup %2619  ;;  %v1707_v9 = vxor.u32 2147483648, %v2618_v2  ;;  %v1898_v40 = vmul.f32 %v1897_v51, %v1895_v24  ;;  %v1770_v55 = vsel %vm1768_vm5, %v1769_v35, %v3872_v19  ;;  %v1926_v63 = vand.u32 8388607, %v1919_v46 }
 0x278   :  { %v1704_v21 = vxor.u32 2147483648, %v2620_v49  ;;  %v1771_v44 = vadd.s32 %v1770_v55, %v1766_v48  ;;  %vm1930_vm6 = vcmp.gt.s32.totalorder %v1929_v33, 0  ;;  %v4159_v37 = vsub.s32 6, %v3235_v10 }
 0x279   :  { %v1708_v8 = vsel %vm1706_vm4, %v1707_v9, %v2620_v49  ;;  %v1899_v58 = vxor.u32 2147483648, %v1898_v40  ;;  %v1931_v56 = vsel %vm1930_vm6, %v1929_v33, 0  ;;  %v3916_v34 = vand.u32 3, %v1908_v16 }
 0x27a   :  { %v1705_v61 = vsel %vm1703_vm2, %v2618_v2, %v1704_v21  ;;  %v3909_v62 = vrot.slane %v3391_v54, %v4159_v37  ;;  %v1772_v60 = vadd.s32 536870912, %v1771_v44  ;;  %v1933_v32 = vand.u32 31, %v1931_v56 }
 0x27b   :  { %v1709_v18 = vsel %vm1702_vm7, %v1705_v61, %v1708_v8  ;;  %v1900_v27 = vsel %vm1817_vm10, %v1899_v58, %v1898_v40  ;;  %v2027_v19 = vshrl.u32 %v2026_v7, 23  ;;  %v1927_v25 = vor.u32 8388608, %v1926_v63 }
 0x27c   :  { %v1710_v38 = vsel %vm1699_vm0, nan, %v1709_v18  ;;  %v1903_v0 = vsel %vm3880_vm3, %v3642_v42, %v1900_v27  ;;  %v3921_v3 = vshrl.u32 %v1772_v60, 30  ;;  %v1934_v52 = vsub.s32 32, %v1933_v32 }
 0x27d   :  { %v2182_v31 = vsel %vm2173_vm1, %v3357_v59, %v1710_v38  ;;  %2621 = vcosq.f32 %v1903_v0  ;;  %v2023_v22 = vand.u32 2147483647, %v3886_v11  ;;  %v1932_v12 = vshrl.u32 %v1931_v56, 5 }
 0x27e   :  { %2191 = vst [vmem:[#allocation8 + $0x20] sm:$0xff] %v2182_v31  ;;  %2623 = vsinq.f32 %v1903_v0  ;;  %v1774_v17 = vshll.u32 %v3921_v3, 30  ;;  %v1936_v24 = vshll.u32 %v2740_v1, %v1933_v32  ;;  %v1939_v51 = vshll.u32 %v2741_v6, %v1933_v32 }
 0x27f   :  { %v1937_v57 = vshrl.u32 %v2741_v6, %v1934_v52  ;;  %v1940_v59 = vshrl.u32 %v4148_v39, %v1934_v52  ;;  %v1942_v15 = vshll.u32 %v4148_v39, %v1933_v32  ;;  %v1943_v14 = vshrl.u32 %v4149_v20, %v1934_v52 }
 0x280   :  { %vm1914_vm8 = vcmp.eq.s32.totalorder %v3916_v34, 2  ;;  %v3932_v2 = vsub.s32 %v1771_v44, %v1774_v17  ;;  %v1945_v35 = vshll.u32 %v4149_v20, %v1933_v32  ;;  %v1946_v49 = vshrl.u32 %v2744_v23, %v1934_v52 }
 0x281   :  { %v2317_v9 = vadd.s32 4294967169, %v2027_v19  ;;  %vm1911_vm9 = vcmp.eq.s32.totalorder %v3916_v34, 0  ;;  %v1935_v40 = vshrl.u32 %v2740_v1, %v1934_v52  ;;  %v1938_v48 = vor.u32 %v1937_v57, %v1936_v24 }
 0x282   :  { %v1941_v33 = vor.u32 %v1940_v59, %v1939_v51  ;;  %v1944_v21 = vor.u32 %v1943_v14, %v1942_v15  ;;  %vm1910_vm10 = vcmp.lt.s32.totalorder %v3916_v34, 2  ;;  %vm2175_vm11 = vcmp.eq.s32.totalorder %v3909_v62, 1 }
 0x283   :  { %v1777_v16 = vsub.s32 0, %v3932_v2  ;;  %v1947_v55 = vor.u32 %v1946_v49, %v1945_v35  ;;  %v1948_v7 = vshll.u32 %v2744_v23, %v1933_v32  ;;  %v1949_v8 = vshrl.u32 %v2745_v47, %v1934_v52 }
 0x284   :  { %vm1907_vm12 = vweird.f32 %v3642_v42  ;;  %vm1951_vm13 = vcmp.lt.s32.totalorder %v1932_v12, 1  ;;  %vm1953_vm14 = vcmp.lt.s32.totalorder %v1932_v12, 3  ;;  %vm1954_vm15 = vcmp.lt.s32.totalorder %v1932_v12, 4 }
 0x285   :  { %v1967_v58 = vshll.u32 %v1927_v25, 8  ;;  %v2306_v44 = vmin.u32 %v1777_v16, %v3932_v2  ;;  %v1950_v61 = vor.u32 %v1949_v8, %v1948_v7  ;;  %v1955_v63 = vsel %vm1951_vm13, %v1935_v40, %v1938_v48 }
 0x286   :  { %v1956_v56 = vsel %vm1954_vm15, %v1944_v21, 2102212464  ;;  %v1767_v18 = vadd.s32 %v3871_v29, %v3868_v36  ;;  %v1959_v37 = vsel %vm1951_vm13, %v1938_v48, %v1941_v33  ;;  %v1960_v60 = vsel %vm1954_vm15, %v1947_v55, 920167782 }
 0x287   :  { %v1957_v27 = vsel %vm1953_vm14, %v1941_v33, %v1956_v56  ;;  %v2622_v38 = vpop.eup %2621  ;;  %v1779_v0 = vclz %v2306_v44  ;;  %vm1952_vm0 = vcmp.lt.s32.totalorder %v1932_v12, 2  ;;  %v1963_v32 = vsel %vm1951_vm13, %v1941_v33, %v1944_v21 }
 0x288   :  { %v2033_v31 = vadd.s32 1, %v2317_v9  ;;  %v2624_v19 = vpop.eup %2623  ;;  %v1915_v25 = vxor.u32 2147483648, %v2622_v38  ;;  %v1958_v52 = vsel %vm1952_vm0, %v1955_v63, %v1957_v27  ;;  %v1961_v17 = vsel %vm1953_vm14, %v1944_v21, %v1960_v60 }
 0x289   :  { %v1964_v24 = vsel %vm1954_vm15, %v1950_v61, 1326507024  ;;  %v1912_v51 = vxor.u32 2147483648, %v2624_v19  ;;  %v2307_v57 = vadd.s32 4294967294, %v1779_v0  ;;  %v1962_v36 = vsel %vm1952_vm0, %v1959_v37, %v1961_v17 }
 0x28a   :  { %v1965_v29 = vsel %vm1953_vm14, %v1947_v55, %v1964_v24  ;;  %v1916_v59 = vsel %vm1914_vm8, %v1915_v25, %v2624_v19  ;;  %v3955_v14 = vmul.u32.u64.low %v1967_v58, %v1962_v36  ;;  %v3956_v35 = vmul.u32.u64.high %v1967_v58, %v1962_v36, %v3955_v14 }
 0x28b   :  { %v1966_v15 = vsel %vm1952_vm0, %v1963_v32, %v1965_v29  ;;  %v1913_v49 = vsel %vm1911_vm9, %v2622_v38, %v1912_v51  ;;  %vm2308_vm1 = vcmp.lt.s32.totalorder %v2307_v57, 0  ;;  %v2030_v33 = vand.u32 8388607, %v2023_v22 }
 0x28c   :  { %v3961_v9 = vmul.u32.u64.low %v1967_v58, %v1966_v15  ;;  %v3962_v40 = vmul.u32.u64.high %v1967_v58, %v1966_v15, %v3961_v9  ;;  %v1917_v48 = vsel %vm1910_vm10, %v1913_v49, %v1916_v59  ;;  %v1782_v12 = vsel %vm2308_vm1, 0, %v2307_v57 }
 0x28d   :  { %vm2034_vm2 = vcmp.gt.s32.totalorder %v2033_v31, 0  ;;  %v1918_v21 = vsel %vm1907_vm12, nan, %v1917_v48  ;;  %v1783_v16 = vsub.s32 32, %v1782_v12  ;;  %v1787_v55 = vsub.s32 4294967266, %v1782_v12 }
 0x28e   :  { %v1797_v7 = vsub.s32 4, %v3921_v3  ;;  %v2184_v8 = vsel %vm2175_vm11, %v3365_v50, %v1918_v21  ;;  %v1974_v44 = vmul.u32 %v1967_v58, %v1958_v52  ;;  %v1977_v34 = vadd.s32 1, %v3956_v35 }
 0x28f   :  { %v2035_v61 = vsel %vm2034_vm2, %v2033_v31, 0  ;;  %2193 = vst [vmem:[#allocation8 + $0x30] sm:$0xff] %v2184_v8  ;;  %v1784_v63 = vshll.u32 %v3932_v2, %v1782_v12  ;;  %v1785_v56 = vshrl.u32 %v1767_v18, %v1783_v16  ;;  %v1788_v27 = vadd.s32 127, %v1787_v55 }
 0x290   :  { %vm1976_vm3 = vc.u32 %v3962_v40, %v3955_v14  ;;  %v2037_v37 = vand.u32 31, %v2035_v61  ;;  %vm1713_vm4 = vcmp.lt.s32.totalorder %v3773_v30, 0  ;;  %v2031_v50 = vor.u32 8388608, %v2030_v33 }
 0x291   :  { %v1978_v42 = vsel %vm1976_vm3, %v1977_v34, %v3956_v35  ;;  %v1786_v60 = vor.u32 %v1785_v56, %v1784_v63  ;;  %v1789_v38 = vshll.u32 %v1788_v27, 23  ;;  %v1798_v2 = vsel %vm1713_vm4, %v1797_v7, %v3921_v3 }
 0x292   :  { %v1979_v0 = vadd.s32 %v1978_v42, %v1974_v44  ;;  %v2038_v62 = vsub.s32 32, %v2037_v37  ;;  %v2040_v32 = vshll.u32 %v2740_v1, %v2037_v37  ;;  %v2043_v25 = vshll.u32 %v2741_v6, %v2037_v37 }
 0x293   :  { %v1790_v58 = vor.u32 4788187, %v1789_v38  ;;  %v1793_v31 = vcvt.s32.f32 %v1786_v60  ;;  %v2036_v36 = vshrl.u32 %v2035_v61, 5  ;;  %v2046_v3 = vshll.u32 %v4148_v39, %v2037_v37 }
 0x294   :  { %v1980_v18 = vadd.s32 536870912, %v1979_v0  ;;  %v2041_v19 = vshrl.u32 %v2741_v6, %v2038_v62  ;;  %v2044_v52 = vshrl.u32 %v4148_v39, %v2038_v62  ;;  %v2047_v51 = vshrl.u32 %v4149_v20, %v2038_v62 }
 0x295   :  { %v1791_v17 = vand.u32 2147483647, %v1790_v58  ;;  %v2050_v57 = vshrl.u32 %v2744_v23, %v2038_v62  ;;  %v2049_v29 = vshll.u32 %v4149_v20, %v2037_v37  ;;  %v2053_v59 = vshrl.u32 %v2745_v47, %v2038_v62 }
 0x296   :  { %v3987_v24 = vshrl.u32 %v1980_v18, 30  ;;  %v2042_v6 = vor.u32 %v2041_v19, %v2040_v32  ;;  %v2045_v49 = vor.u32 %v2044_v52, %v2043_v25  ;;  %vm3997_vm5 = vcmp.le.f32.partialorder %v1711_v5, 0.7853982 }
 0x297   :  { %v1794_v15 = vmul.f32 %v1793_v31, %v1791_v17  ;;  %v2051_v48 = vor.u32 %v2050_v57, %v2049_v29  ;;  %v2052_v12 = vshll.u32 %v2744_v23, %v2037_v37  ;;  %v1800_v39 = vsel %vm3997_vm5, 0, %v1798_v2 }
 0x298   :  { %v1982_v35 = vshll.u32 %v3987_v24, 30  ;;  %v2048_v47 = vor.u32 %v2047_v51, %v2046_v3  ;;  %v2039_v21 = vshrl.u32 %v2740_v1, %v2038_v62  ;;  %vm2055_vm6 = vcmp.lt.s32.totalorder %v2036_v36, 1 }
 0x299   :  { %v1795_v33 = vxor.u32 2147483648, %v1794_v15  ;;  %v2054_v16 = vor.u32 %v2053_v59, %v2052_v12  ;;  %v2071_v55 = vshll.u32 %v2031_v50, 8  ;;  %vm2058_vm7 = vcmp.lt.s32.totalorder %v2036_v36, 4 }
 0x29a   :  { %v1983_v20 = vsub.s32 %v1979_v0, %v1982_v35  ;;  %v2063_v8 = vsel %vm2055_vm6, %v2042_v6, %v2045_v49  ;;  %vm2056_vm8 = vcmp.lt.s32.totalorder %v2036_v36, 2  ;;  %vm2057_vm9 = vcmp.lt.s32.totalorder %v2036_v36, 3 }
 0x29b   :  { %v1796_v5 = vsel %vm1713_vm4, %v1795_v33, %v1794_v15  ;;  %v2064_v44 = vsel %vm2058_vm7, %v2051_v48, 920167782  ;;  %v2060_v1 = vsel %vm2058_vm7, %v2048_v47, 2102212464  ;;  %v2067_v56 = vsel %vm2055_vm6, %v2045_v49, %v2048_v47 }
 0x29c   :  { %v1985_v7 = vsub.s32 0, %v1983_v20  ;;  %v1799_v23 = vsel %vm3997_vm5, %v3773_v30, %v1796_v5  ;;  %v2065_v61 = vsel %vm2057_vm9, %v2048_v47, %v2064_v44  ;;  %v2068_v27 = vsel %vm2058_vm7, %v2054_v16, 1326507024 }
 0x29d   :  { %2625 = vcosq.f32 %v1799_v23  ;;  %v2066_v63 = vsel %vm2056_vm8, %v2063_v8, %v2065_v61  ;;  %v2059_v37 = vsel %vm2055_vm6, %v2039_v21, %v2042_v6  ;;  %v2061_v60 = vsel %vm2057_vm9, %v2045_v49, %v2060_v1 }
 0x29e   :  { %v2314_v34 = vmin.u32 %v1985_v7, %v1983_v20  ;;  %2627 = vsinq.f32 %v1799_v23  ;;  %v2069_v38 = vsel %vm2057_vm9, %v2051_v48, %v2068_v27  ;;  %v1804_v62 = vadd.s32 3, %v1800_v39 }
 0x29f   :  { %v4014_v0 = vmul.u32.u64.low %v2071_v55, %v2066_v63  ;;  %v4015_v50 = vmul.u32.u64.high %v2071_v55, %v2066_v63, %v4014_v0  ;;  %v2070_v2 = vsel %vm2056_vm8, %v2067_v56, %v2069_v38  ;;  %v2062_v31 = vsel %vm2056_vm8, %v2059_v37, %v2061_v60 }
 0x2a0   :  { %v1987_v42 = vclz %v2314_v34  ;;  %v4019_v18 = vmul.u32.u64.low %v2071_v55, %v2070_v2  ;;  %v4020_v32 = vmul.u32.u64.high %v2071_v55, %v2070_v2, %v4019_v18  ;;  %v1805_v52 = vand.u32 3, %v1804_v62 }
 0x2a1   :  { %v2081_v25 = vadd.s32 1, %v4015_v50  ;;  %v1975_v17 = vadd.s32 %v3955_v14, %v3962_v40  ;;  %v2156_v3 = vrot.slane %v3391_v54, %v1159_v45  ;;  %v2078_v29 = vmul.u32 %v2071_v55, %v2062_v31 }
 0x2a2   :  { %v2315_v58 = vadd.s32 4294967294, %v1987_v42  ;;  %vm2080_vm11 = vc.u32 %v4020_v32, %v4014_v0  ;;  %vm1810_vm12 = vcmp.eq.s32.totalorder %v1805_v52, 2  ;;  %vm1807_vm13 = vcmp.eq.s32.totalorder %v1805_v52, 0 }
 0x2a3   :  { %v2082_v6 = vsel %vm2080_vm11, %v2081_v25, %v4015_v50  ;;  %vm1806_vm14 = vcmp.lt.s32.totalorder %v1805_v52, 2  ;;  %vm2174_vm15 = vcmp.eq.s32.totalorder %v2156_v3, 1  ;;  %vm1803_vm0 = vweird.f32 %v3773_v30 }
 0x2a4   :  { %vm2316_vm10 = vcmp.lt.s32.totalorder %v2315_v58, 0  ;;  %v2083_v48 = vadd.s32 %v2082_v6, %v2078_v29  ;;  %v2005_v44 = vsub.s32 4, %v3987_v24  ;;  %vm1921_vm1 = vcmp.lt.s32.totalorder %v3836_v43, 0 }
 0x2a5   :  { %v1990_v19 = vsel %vm2316_vm10, 0, %v2315_v58  ;;  %vm1920_vm2 = vcmp.le.f32.partialorder %v1919_v46, 0.7853982  ;;  %v2079_v50 = vadd.s32 %v4014_v0, %v4020_v32  ;;  %vm2011_vm8 = vweird.f32 %v3836_v43 }
 0x2a6   :  { %v1991_v51 = vsub.s32 32, %v1990_v19  ;;  %v1995_v57 = vsub.s32 4294967266, %v1990_v19  ;;  %v1992_v36 = vshll.u32 %v1983_v20, %v1990_v19  ;;  %v2084_v45 = vadd.s32 536870912, %v2083_v48 }
 0x2a7   :  { %v2626_v59 = vpop.eup %2625  ;;  %v2006_v63 = vsel %vm1921_vm1, %v2005_v44, %v3987_v24  ;;  %v2164_v19 = vrot.slane %v3391_v54, %v1167_v28  ;;  %vm2025_vm9 = vcmp.lt.s32.totalorder %v3886_v11, 0  ;;  %vm2024_vm10 = vcmp.le.f32.partialorder %v2023_v22, 0.7853982 }
 0x2a8   :  { %v1993_v15 = vshrl.u32 %v1975_v17, %v1991_v51  ;;  %v1996_v35 = vadd.s32 127, %v1995_v57  ;;  %v2628_v49 = vpop.eup %2627  ;;  %v1811_v9 = vxor.u32 2147483648, %v2626_v59  ;;  %v2085_v21 = vshrl.u32 %v2084_v45, 30 }
 0x2a9   :  { %v1808_v14 = vxor.u32 2147483648, %v2628_v49  ;;  %vm2176_vm7 = vcmp.eq.s32.totalorder %v2164_v19, 1 }
 0x2aa   :  { %v1994_v40 = vor.u32 %v1993_v15, %v1992_v36  ;;  %v1997_v12 = vshll.u32 %v1996_v35, 23  ;;  %v1812_v33 = vsel %vm1810_vm12, %v1811_v9, %v2628_v49  ;;  %v2086_v8 = vshll.u32 %v2085_v21, 30 }
 0x2ab   :  { %v1809_v39 = vsel %vm1807_vm13, %v2626_v59, %v1808_v14  ;;  %v2109_v15 = vsub.s32 4, %v2085_v21 }
 0x2ac   :  { %v1998_v47 = vor.u32 4788187, %v1997_v12  ;;  %v1813_v20 = vsel %vm1806_vm14, %v1809_v39, %v1812_v33  ;;  %v2001_v5 = vcvt.s32.f32 %v1994_v40  ;;  %v2087_v34 = vsub.s32 %v2083_v48, %v2086_v8 }
 0x2ad   :  { %v1814_v16 = vsel %vm1803_vm0, nan, %v1813_v20  ;;  %v2110_v49 = vsel %vm2025_vm9, %v2109_v15, %v2085_v21  ;;  %vm2115_vm0 = vweird.f32 %v3886_v11 }
 0x2ae   :  { %v1999_v55 = vand.u32 2147483647, %v1998_v47  ;;  %v2183_v7 = vsel %vm2174_vm15, %v3367_v4, %v1814_v16  ;;  %v2089_v61 = vsub.s32 0, %v2087_v34  ;;  %v2008_v4 = vsel %vm1920_vm2, 0, %v2006_v63 }
 0x2af   :  { %2192 = vst [vmem:[#allocation8 + $0x28] sm:$0xff] %v2183_v7  ;;  %v2012_v60 = vadd.s32 3, %v2008_v4 }
 0x2b0   :  { %v2002_v23 = vmul.f32 %v2001_v5, %v1999_v55  ;;  %v2318_v27 = vmin.u32 %v2089_v61, %v2087_v34 }
 0x2b1   :  { %v2013_v46 = vand.u32 3, %v2012_v60 }
 0x2b2   :  { %v2003_v1 = vxor.u32 2147483648, %v2002_v23  ;;  %v2091_v42 = vclz %v2318_v27 }
 0x2b3   :  { %vm2018_vm4 = vcmp.eq.s32.totalorder %v2013_v46, 2  ;;  %vm2015_vm5 = vcmp.eq.s32.totalorder %v2013_v46, 0  ;;  %vm2014_vm6 = vcmp.lt.s32.totalorder %v2013_v46, 2 }
 0x2b4   :  { %v2004_v30 = vsel %vm1921_vm1, %v2003_v1, %v2002_v23  ;;  %v2319_v37 = vadd.s32 4294967294, %v2091_v42 }
 0x2b5   :  { %v2007_v56 = vsel %vm1920_vm2, %v3836_v43, %v2004_v30  ;;  %v2112_v43 = vsel %vm2024_vm10, 0, %v2110_v49 }
 0x2b6   :  { %2629 = vcosq.f32 %v2007_v56  ;;  %vm2320_vm3 = vcmp.lt.s32.totalorder %v2319_v37, 0  ;;  %v2116_v48 = vadd.s32 3, %v2112_v43 }
 0x2b7   :  { %2631 = vsinq.f32 %v2007_v56  ;;  %v2094_v38 = vsel %vm2320_vm3, 0, %v2319_v37 }
 0x2b8   :  { %v2095_v62 = vsub.s32 32, %v2094_v38  ;;  %v2099_v58 = vsub.s32 4294967266, %v2094_v38  ;;  %v2096_v2 = vshll.u32 %v2087_v34, %v2094_v38  ;;  %v2117_v40 = vand.u32 3, %v2116_v48 }
 0x2ba   :  { %v2097_v18 = vshrl.u32 %v2079_v50, %v2095_v62  ;;  %v2100_v24 = vadd.s32 127, %v2099_v58  ;;  %vm2122_vm12 = vcmp.eq.s32.totalorder %v2117_v40, 2  ;;  %vm2119_vm13 = vcmp.eq.s32.totalorder %v2117_v40, 0 }
 0x2bb   :  { %vm2118_vm14 = vcmp.lt.s32.totalorder %v2117_v40, 2 }
 0x2bc   :  { %v2098_v17 = vor.u32 %v2097_v18, %v2096_v2  ;;  %v2101_v51 = vshll.u32 %v2100_v24, 23 }
 0x2be   :  { %v2102_v0 = vor.u32 4788187, %v2101_v51  ;;  %v2105_v36 = vcvt.s32.f32 %v2098_v17 }
 0x2c0   :  { %v2630_v31 = vpop.eup %2629  ;;  %v2103_v59 = vand.u32 2147483647, %v2102_v0 }
 0x2c1   :  { %v2632_v25 = vpop.eup %2631  ;;  %v2019_v52 = vxor.u32 2147483648, %v2630_v31 }
 0x2c2   :  { %v2016_v57 = vxor.u32 2147483648, %v2632_v25  ;;  %v2106_v28 = vmul.f32 %v2105_v36, %v2103_v59 }
 0x2c3   :  { %v2020_v3 = vsel %vm2018_vm4, %v2019_v52, %v2632_v25 }
 0x2c4   :  { %v2017_v32 = vsel %vm2015_vm5, %v2630_v31, %v2016_v57  ;;  %v2107_v35 = vxor.u32 2147483648, %v2106_v28 }
 0x2c5   :  { %v2021_v29 = vsel %vm2014_vm6, %v2017_v32, %v2020_v3 }
 0x2c6   :  { %v2022_v10 = vsel %vm2011_vm8, nan, %v2021_v29  ;;  %v2108_v6 = vsel %vm2025_vm9, %v2107_v35, %v2106_v28 }
 0x2c7   :  { %v2185_v54 = vsel %vm2176_vm7, %v3375_v26, %v2022_v10  ;;  %v2111_v9 = vsel %vm2024_vm10, %v3886_v11, %v2108_v6  ;;  %v2128_v26 = vld [vmem:[%s4073_s3 + $0x8] sm:$0x1]  ;;  %s2704_s3 = scalar_lea.vmem %s2203_s30, 1152 }
 0x2c8   :  { %2194 = vst [vmem:[#allocation8 + $0x38] sm:$0xff] %v2185_v54  ;;  %2633 = vcosq.f32 %v2111_v9  ;;  %vm2130_vm11 = vcmp.gt.f32.partialorder %v2128_v26, 0.5  ;;  %p2705_p10 = scmp.ne.s32.totalorder %s2203_s30, %s2704_s3  ;;  %p2710_p12 = scmp.lt.s32.totalorder %s2704_s3, %s2704_s3 }
 0x2c9   :  { %2635 = vsinq.f32 %v2111_v9  ;;  %v2132_v14 = vsel %vm2130_vm11, 1, %v4120_v41 }
 0x2ca   :  { %v2168_v33 = vrot.slane %v2132_v14, %v3241_v13  ;;  %p2711_p13 = por %p2710_p12, %p2709_p11 }
 0x2cc   :  { %vm2177_vm15 = vcmp.eq.s32.totalorder %v2168_v33, 1  ;;  %p2712_p0 = pnand %p2711_p13, %p2705_p10 }
 0x2d2   :  { %v2634_v12 = vpop.eup %2633 }
 0x2d3   :  { %v2636_v22 = vpop.eup %2635  ;;  %v2123_v45 = vxor.u32 2147483648, %v2634_v12 }
 0x2d4   :  { %v2120_v39 = vxor.u32 2147483648, %v2636_v22 }
 0x2d5   :  { %v2124_v47 = vsel %vm2122_vm12, %v2123_v45, %v2636_v22 }
 0x2d6   :  { %v2121_v20 = vsel %vm2119_vm13, %v2634_v12, %v2120_v39 }
 0x2d7   :  { %v2125_v21 = vsel %vm2118_vm14, %v2121_v20, %v2124_v47 }
 0x2d8   :  { %v2126_v16 = vsel %vm2115_vm0, nan, %v2125_v21 }
 0x2d9   :  { %v2186_v41 = vsel %vm2177_vm15, %v3530_v53, %v2126_v16 }
 0x2da   :  { %2195 = vst [vmem:[#allocation8 + $0x40] sm:$0xff] %v2186_v41 }
 0x2db   :  { %2715 = shalt.err (!%p2712_p0)
}
 0x2dc   :  { %s2716_s7 = scalar_lea.hbm %s4074_s4, 1152 }
 0x2dd   :  { %p2717_p1 = scmp.ne.s32.totalorder %s4074_s4, %s2716_s7  ;;  %p2720_p2 = scmp.lt.u32.totalorder %s2716_s7, %s4074_s4 }
 0x2df   :  { %p2722_p3 = pnand %p2720_p2, %p2717_p1 }
 0x2e1   :  { %2725 = shalt.err (!%p2722_p3)
}
 0x2e2   :  { %2205 = dma.vmem_to_hbm [thread:$0]  %s2203_s30, 1152, %s4074_s4, [#allocation4]  }
 0x2e3   :  { %2730 = dma.done.wait [#allocation4], 1152  }
 0x2e4   :  { %2731 = vsyncadd [#allocation4], 4294966144 }
 0x2e5   :  { %2209 = vsyncpa [#allocation3], 1 }
 0x2e6   :  { %2210 = vsyncpa [#allocation6], 1 }
 0x2e7   :  { %2211 = vsyncpa [#allocation4], 1 }

</bundles_post_ra>
